<compile_context>
chip_gen: v7x
topology: tpu7x:2x2x1
jax: 0.10.0
libtpu: 0.0.40
codegen_flags: <defaults>
</compile_context>

<pallas_src>
import functools

import jax
import jax.numpy as jnp
from jax import lax
from jax.experimental import pallas as pl
from jax.experimental.pallas import tpu as pltpu


def _glove_embed_kernel(idx_ref, table_ref, out_ref, *, num_special_tokens,
                        num_pretrained_rows, pack):
    """Fused two-table gather + add as a single one-hot MXU matmul.

    idx_ref:   (G, P)       int32   -- P tokens packed per output row
    table_ref: (P*V, P*D)   float32 -- block-diagonal stack of the combined
                                       [special ; pretrained] table (V = Vs+Vp)
    out_ref:   (G, P*D)     float32 -- lane-dense packed output block
    """
    nst = num_special_tokens
    vs = nst + 1                       # rows in the special table
    vp = num_pretrained_rows           # rows in the pretrained table
    v = vs + vp                        # rows in the combined table

    idx = idx_ref[...]                 # (G, P) int32
    g = idx.shape[0]

    # Clamp exactly like the PyTorch module.
    sp_idx = jnp.clip(idx, 0, nst)                         # -> rows [0, Vs)
    pre_idx = jnp.clip(idx - (nst - 1), 0, vp - 1) + vs    # -> rows [Vs, V)

    # Build a "two-hot" matrix over the block-diagonal K dimension: token p of
    # each packed row lights up (p*V + sp_idx) and (p*V + pre_idx).  One matmul
    # then performs both gathers AND the cross-table add (MXU accumulation).
    kcol = lax.broadcasted_iota(jnp.int32, (g, pack * v), 1)
    hot = None
    for p in range(pack):              # pack is a small static Python int
        base = p * v
        term = (kcol == base + sp_idx[:, p:p + 1]) | \
               (kcol == base + pre_idx[:, p:p + 1])
        hot = term if hot is None else hot | term

    onehot = hot.astype(table_ref.dtype)
    out_ref[...] = jnp.dot(onehot, table_ref[...],
                           preferred_element_type=jnp.float32
                           ).astype(out_ref.dtype)


@functools.partial(jax.jit, static_argnames=("token_tile",))
def glove_embedding(indices, special_table, pretrained_table, *, token_tile=512):
    """indices: (B, S) int -> (B, S, D) float32."""
    b, s = indices.shape
    vs, d = special_table.shape          # Vs = num_special_tokens + 1
    nst = vs - 1
    vp = pretrained_table.shape[0]       # vocab_size + 2

    # Pack P tokens per output row so stores are lane-dense (P*D == 128 when D
    # divides 128).  Falls back to P = 1 for D >= 128 or awkward D.
    pack = 128 // d if (d < 128 and 128 % d == 0) else 1

    # Token tile: multiple of (8 * pack) so every block keeps >= 8 sublanes.
    tile = max(int(token_tile), 8 * pack)
    tile = ((tile + 8 * pack - 1) // (8 * pack)) * (8 * pack)

    n = b * s
    n_pad = pl.cdiv(n, tile) * tile

    # Flatten + pad with index 0 (a valid row); padded rows are sliced off below.
    idx_flat = indices.reshape(n).astype(jnp.int32)
    idx_flat = jnp.pad(idx_flat, (0, n_pad - n))
    idx_packed = idx_flat.reshape(n_pad // pack, pack)

    # Combined [special ; pretrained] table => one fused gather matmul.
    combined = jnp.concatenate(
        [special_table.astype(jnp.float32),
         pretrained_table.astype(jnp.float32)], axis=0)    # (V, D)
    if pack > 1:
        # Block-diagonal P-stack: (P*V, P*D).  Row-major, the packed output
        # (N/P, P*D) is bit-identical to the unpacked (N, D).
        table = jnp.kron(jnp.eye(pack, dtype=combined.dtype), combined)
    else:
        table = combined

    g_rows = tile // pack
    kernel = functools.partial(
        _glove_embed_kernel,
        num_special_tokens=nst, num_pretrained_rows=vp, pack=pack)

    out_packed = pl.pallas_call(
        kernel,
        out_shape=jax.ShapeDtypeStruct((n_pad // pack, pack * d), jnp.float32),
        grid_spec=pltpu.PrefetchScalarGridSpec(
            num_scalar_prefetch=0,
            grid=(n_pad // tile,),
            in_specs=[
                # Token-index block.
                pl.BlockSpec((g_rows, pack), lambda i: (i, 0)),
                # Whole (tiny) table, grid-invariant: same block every step so
                # it is only DMA'd once by the pipeline.
                pl.BlockSpec(table.shape, lambda i: (0, 0)),
            ],
            out_specs=pl.BlockSpec((g_rows, pack * d), lambda i: (i, 0)),
        ),
        compiler_params=pltpu.CompilerParams(
            dimension_semantics=("parallel",)),
    )(idx_packed, table)

    return out_packed.reshape(n_pad, d)[:n].reshape(b, s, d)


def _reference(indices, special_table, pretrained_table):
    nst = special_table.shape[0] - 1
    vp = pretrained_table.shape[0]
    sp_idx = jnp.clip(indices, 0, nst)
    pre_idx = jnp.clip(indices - (nst - 1), 0, vp - 1)
    return special_table[sp_idx] + pretrained_table[pre_idx]


if __name__ == "__main__":
    # Synthetic, deterministic parameters (no checkpoint loading).
    key = jax.random.PRNGKey(0)
    k_special, k_pre, k_idx1, k_idx2 = jax.random.split(key, 4)

    num_special_tokens = 3          # glove.token_mapper.mapped_output_size()
    embedding_dim = 32              # glove.embedding_dim
    vocab_size = 50                 # glove.vocab_size

    # Special embedding table: (nst + 1, D), padding row (index nst) is zeros,
    # other rows ~ Normal(0, 0.1) as in reset_parameters().
    special_rows = 0.1 * jax.random.normal(
        k_special, (num_special_tokens, embedding_dim), dtype=jnp.float32)
    special_table = jnp.concatenate(
        [special_rows, jnp.zeros((1, embedding_dim), jnp.float32)], axis=0)

    # Pretrained GloVe table: (vocab_size + 2, D) so the clamp upper bound
    # (vocab_size + 1) is a valid row, mirroring glove.numbers.
    pretrained_table = jax.random.normal(
        k_pre, (vocab_size + 2, embedding_dim), dtype=jnp.float32)

    total_index_range = num_special_tokens + vocab_size

    # Case 1: tiny (B, S) -- single grid step, heavy tail padding.
    idx_a = jax.random.randint(
        k_idx1, (2, 8), 0, total_index_range, dtype=jnp.int32)
    out_a = jax.block_until_ready(
        glove_embedding(idx_a, special_table, pretrained_table))
    ref_a = _reference(idx_a, special_table, pretrained_table)
    assert out_a.shape == (2, 8, embedding_dim)
    assert out_a.dtype == jnp.float32
    assert jnp.allclose(out_a, ref_a, atol=1e-5), "case 1 mismatch vs reference"

    # Case 2: N not a multiple of the token tile and > 1 grid step.
    idx_b = jax.random.randint(
        k_idx2, (4, 160), 0, total_index_range, dtype=jnp.int32)
    out_b = jax.block_until_ready(
        glove_embedding(idx_b, special_table, pretrained_table))
    ref_b = _reference(idx_b, special_table, pretrained_table)
    assert out_b.shape == (4, 160, embedding_dim)
    assert out_b.dtype == jnp.float32
    assert jnp.allclose(out_b, ref_b, atol=1e-5), "case 2 mismatch vs reference"

    print("KERNEL_OK")
</pallas_src>

<mosaic_0001>
module attributes {stable_mosaic.version = 11 : i64} {
  func.func @_glove_embed_kernel(%arg0: i32, %arg1: memref<128x4xi32, #tpu.memory_space<vmem>>, %arg2: memref<224x128xf32, #tpu.memory_space<vmem>>, %arg3: memref<128x128xf32, #tpu.memory_space<vmem>>) attributes {dimension_semantics = [#tpu.dimension_semantics<parallel>], iteration_bounds = array<i64: 1>, scalar_prefetch = 0 : i64, scratch_operands = 0 : i64, tpu.core_type = #tpu.core_type<tc>, window_params = [{transform_indices = @transform_0, window_bounds = array<i64: 128, 4>}, {pipeline_mode = #tpu.pipeline_mode<synchronous>, transform_indices = @transform_1, window_bounds = array<i64: 224, 128>}, {transform_indices = @transform_2, window_bounds = array<i64: 128, 128>}]} {
    %c0 = arith.constant 0 : index
    %c0_0 = arith.constant 0 : index
    %0 = vector.load %arg1[%c0, %c0_0] : memref<128x4xi32, #tpu.memory_space<vmem>>, vector<128x4xi32>
    %c0_i32 = arith.constant 0 : i32
    %c3_i32 = arith.constant 3 : i32
    %1 = vector.broadcast %c0_i32 : i32 to vector<128x4xi32>
    %2 = arith.maxsi %1, %0 : vector<128x4xi32>
    %3 = vector.broadcast %c3_i32 : i32 to vector<128x4xi32>
    %4 = arith.minsi %3, %2 : vector<128x4xi32>
    %c2_i32 = arith.constant 2 : i32
    %5 = vector.broadcast %c2_i32 : i32 to vector<128x4xi32>
    %6 = arith.subi %0, %5 : vector<128x4xi32>
    %c0_i32_1 = arith.constant 0 : i32
    %c51_i32 = arith.constant 51 : i32
    %7 = vector.broadcast %c0_i32_1 : i32 to vector<128x4xi32>
    %8 = arith.maxsi %7, %6 : vector<128x4xi32>
    %9 = vector.broadcast %c51_i32 : i32 to vector<128x4xi32>
    %10 = arith.minsi %9, %8 : vector<128x4xi32>
    %c4_i32 = arith.constant 4 : i32
    %11 = vector.broadcast %c4_i32 : i32 to vector<128x4xi32>
    %12 = arith.addi %10, %11 : vector<128x4xi32>
    %13 = tpu.iota {dimensions = array<i32: 1>} : vector<128x224xi32>
    %14 = vector.extract_strided_slice %4 {offsets = [0, 0], sizes = [128, 1], strides = [1, 1]} : vector<128x4xi32> to vector<128x1xi32>
    %c0_i32_2 = arith.constant 0 : i32
    %15 = vector.broadcast %c0_i32_2 : i32 to vector<128x1xi32>
    %16 = arith.addi %15, %14 : vector<128x1xi32>
    %17 = vector.broadcast %16 : vector<128x1xi32> to vector<128x224xi32>
    %18 = arith.cmpi eq, %13, %17 : vector<128x224xi32>
    %19 = vector.extract_strided_slice %12 {offsets = [0, 0], sizes = [128, 1], strides = [1, 1]} : vector<128x4xi32> to vector<128x1xi32>
    %c0_i32_3 = arith.constant 0 : i32
    %20 = vector.broadcast %c0_i32_3 : i32 to vector<128x1xi32>
    %21 = arith.addi %20, %19 : vector<128x1xi32>
    %22 = vector.broadcast %21 : vector<128x1xi32> to vector<128x224xi32>
    %23 = arith.cmpi eq, %13, %22 : vector<128x224xi32>
    %24 = arith.ori %18, %23 : vector<128x224xi1>
    %25 = vector.extract_strided_slice %4 {offsets = [0, 1], sizes = [128, 1], strides = [1, 1]} : vector<128x4xi32> to vector<128x1xi32>
    %c56_i32 = arith.constant 56 : i32
    %26 = vector.broadcast %c56_i32 : i32 to vector<128x1xi32>
    %27 = arith.addi %26, %25 : vector<128x1xi32>
    %28 = vector.broadcast %27 : vector<128x1xi32> to vector<128x224xi32>
    %29 = arith.cmpi eq, %13, %28 : vector<128x224xi32>
    %30 = vector.extract_strided_slice %12 {offsets = [0, 1], sizes = [128, 1], strides = [1, 1]} : vector<128x4xi32> to vector<128x1xi32>
    %c56_i32_4 = arith.constant 56 : i32
    %31 = vector.broadcast %c56_i32_4 : i32 to vector<128x1xi32>
    %32 = arith.addi %31, %30 : vector<128x1xi32>
    %33 = vector.broadcast %32 : vector<128x1xi32> to vector<128x224xi32>
    %34 = arith.cmpi eq, %13, %33 : vector<128x224xi32>
    %35 = arith.ori %29, %34 : vector<128x224xi1>
    %36 = arith.ori %24, %35 : vector<128x224xi1>
    %37 = vector.extract_strided_slice %4 {offsets = [0, 2], sizes = [128, 1], strides = [1, 1]} : vector<128x4xi32> to vector<128x1xi32>
    %c112_i32 = arith.constant 112 : i32
    %38 = vector.broadcast %c112_i32 : i32 to vector<128x1xi32>
    %39 = arith.addi %38, %37 : vector<128x1xi32>
    %40 = vector.broadcast %39 : vector<128x1xi32> to vector<128x224xi32>
    %41 = arith.cmpi eq, %13, %40 : vector<128x224xi32>
    %42 = vector.extract_strided_slice %12 {offsets = [0, 2], sizes = [128, 1], strides = [1, 1]} : vector<128x4xi32> to vector<128x1xi32>
    %c112_i32_5 = arith.constant 112 : i32
    %43 = vector.broadcast %c112_i32_5 : i32 to vector<128x1xi32>
    %44 = arith.addi %43, %42 : vector<128x1xi32>
    %45 = vector.broadcast %44 : vector<128x1xi32> to vector<128x224xi32>
    %46 = arith.cmpi eq, %13, %45 : vector<128x224xi32>
    %47 = arith.ori %41, %46 : vector<128x224xi1>
    %48 = arith.ori %36, %47 : vector<128x224xi1>
    %49 = vector.extract_strided_slice %4 {offsets = [0, 3], sizes = [128, 1], strides = [1, 1]} : vector<128x4xi32> to vector<128x1xi32>
    %c168_i32 = arith.constant 168 : i32
    %50 = vector.broadcast %c168_i32 : i32 to vector<128x1xi32>
    %51 = arith.addi %50, %49 : vector<128x1xi32>
    %52 = vector.broadcast %51 : vector<128x1xi32> to vector<128x224xi32>
    %53 = arith.cmpi eq, %13, %52 : vector<128x224xi32>
    %54 = vector.extract_strided_slice %12 {offsets = [0, 3], sizes = [128, 1], strides = [1, 1]} : vector<128x4xi32> to vector<128x1xi32>
    %c168_i32_6 = arith.constant 168 : i32
    %55 = vector.broadcast %c168_i32_6 : i32 to vector<128x1xi32>
    %56 = arith.addi %55, %54 : vector<128x1xi32>
    %57 = vector.broadcast %56 : vector<128x1xi32> to vector<128x224xi32>
    %58 = arith.cmpi eq, %13, %57 : vector<128x224xi32>
    %59 = arith.ori %53, %58 : vector<128x224xi1>
    %60 = arith.ori %48, %59 : vector<128x224xi1>
    %61 = arith.extui %60 : vector<128x224xi1> to vector<128x224xi32>
    %62 = arith.sitofp %61 : vector<128x224xi32> to vector<128x224xf32>
    %c0_7 = arith.constant 0 : index
    %c0_8 = arith.constant 0 : index
    %63 = vector.load %arg2[%c0_7, %c0_8] : memref<224x128xf32, #tpu.memory_space<vmem>>, vector<224x128xf32>
    %cst = arith.constant dense<0.000000e+00> : vector<128x128xf32>
    %64 = tpu.matmul %62, %63, %cst {dimension_numbers = #tpu.dot_dimension_numbers<[1], [0], [0], [1], [0, 0, 1, 1], [], []>} : vector<128x224xf32>, vector<224x128xf32>, vector<128x128xf32> -> vector<128x128xf32>
    %c0_9 = arith.constant 0 : index
    %c0_10 = arith.constant 0 : index
    %65 = vector.load %arg3[%c0_9, %c0_10] : memref<128x128xf32, #tpu.memory_space<vmem>>, vector<128x128xf32>
    tpu.vector_store %arg3[%c0_9, %c0_10], %64 {strides = array<i32>} : memref<128x128xf32, #tpu.memory_space<vmem>>, vector<128x128xf32>,
    return
  }
  func.func @transform_0(%arg0: i32) -> (i32, i32) {
    %c0_i32 = arith.constant 0 : i32
    %c0_i32_0 = arith.constant 0 : i32
    return %arg0, %c0_i32 : i32, i32
  }
  func.func @transform_1(%arg0: i32) -> (i32, i32) {
    %c0_i32 = arith.constant 0 : i32
    %c0_i32_0 = arith.constant 0 : i32
    %c0_i32_1 = arith.constant 0 : i32
    return %c0_i32, %c0_i32_0 : i32, i32
  }
  func.func @transform_2(%arg0: i32) -> (i32, i32) {
    %c0_i32 = arith.constant 0 : i32
    %c0_i32_0 = arith.constant 0 : i32
    return %arg0, %c0_i32 : i32, i32
  }
}

</mosaic_0001>

<bundles_post_ra>
// kernel: glove_embedding.1
= control target key start
LH: loop header
LB: loop body
LE: loop exit
PB: predicated region body
PF: predicated region fallthrough
CT: control target
= control target key end

     0   :  { %v1624_v0 = vmov 0   ;;  %s3467_s0 = inlined_call_operand.vmem [shape: s32[128,4], index: 0, kind: input, shape index: {}]   ;;  %s3468_s1 = inlined_call_operand.vmem [shape: f32[224,128], index: 1, kind: input, shape index: {}]   ;;  %s3469_s2 = inlined_call_operand.vmem [shape: f32[128,128], index: 2, kind: output, shape index: {}]  }
   0x1   :  { %1597 = vset.pattern.permute.xlu1 %v1624_v0  ;;  %1596 = vset.pattern.permute.xlu0 %v1624_v0  ;;  %v1648_v1 = vld [vmem:[%s3467_s0 + $0x10] sm:$0xff]  ;;  %v11_v2 = vld [vmem:[%s3467_s0] sm:$0xff]  ;;  %v1656_v3 = vld [vmem:[%s3467_s0 + $0x18] sm:$0xff] }
   0x2   :  { %vm31_vm0 = vcmp.gt.s32.totalorder %v1648_v1, 0  ;;  %vm27_vm1 = vcmp.gt.s32.totalorder %v11_v2, 0  ;;  %v12_v4 = vld [vmem:[%s3467_s0 + $0x8] sm:$0xff]  ;;  %vm33_vm2 = vcmp.gt.s32.totalorder %v1656_v3, 0  ;;  %v1673_v9 = vld [vmem:[%s3467_s0 + $0x20] sm:$0xff]  ;;  %v1682_v13 = vld [vmem:[%s3467_s0 + $0x38] sm:$0xff] }
   0x3   :  { %v32_v5 = vsel %vm31_vm0, %v1648_v1, 0  ;;  %v28_v6 = vsel %vm27_vm1, %v11_v2, 0  ;;  %v1667_v7 = vld [vmem:[%s3467_s0 + $0x28] sm:$0xff]  ;;  %v34_v8 = vsel %vm33_vm2, %v1656_v3, 0  ;;  %vm29_vm5 = vcmp.gt.s32.totalorder %v12_v4, 0  ;;  %v1696_v17 = vld [vmem:[%s3467_s0 + $0x30] sm:$0xff] }
   0x4   :  { %vm63_vm3 = vcmp.lt.s32.totalorder %v32_v5, 3  ;;  %vm59_vm4 = vcmp.lt.s32.totalorder %v28_v6, 3  ;;  %vm65_vm6 = vcmp.lt.s32.totalorder %v34_v8, 3  ;;  %v30_v12 = vsel %vm29_vm5, %v12_v4, 0  ;;  %v1703_v19 = vld [vmem:[%s3467_s0 + $0x48] sm:$0xff]  ;;  %v1709_v21 = vld [vmem:[%s3467_s0 + $0x40] sm:$0xff] }
   0x5   :  { %v1675_v10 = vsel %vm63_vm3, %v32_v5, 3  ;;  %v1677_v11 = vsel %vm59_vm4, %v28_v6, 3  ;;  %vm61_vm7 = vcmp.lt.s32.totalorder %v30_v12, 3  ;;  %vm37_vm8 = vcmp.gt.s32.totalorder %v1667_v7, 0  ;;  %v1723_v25 = vld [vmem:[%s3467_s0 + $0x58] sm:$0xff]  ;;  %v1729_v26 = vld [vmem:[%s3467_s0 + $0x50] sm:$0xff] }
   0x6   :  { %197 = vperm.xlu1 %1597, %v1675_v10   ;;  %191 = vperm.xlu0 %1596, %v1677_v11   ;;  %v1687_v14 = vsel %vm65_vm6, %v34_v8, 3  ;;  %v1689_v15 = vsel %vm61_vm7, %v30_v12, 3  ;;  %v38_v16 = vsel %vm37_vm8, %v1667_v7, 0  ;;  %vm35_vm9 = vcmp.gt.s32.totalorder %v1673_v9, 0  ;;  %v1744_v31 = vld [vmem:[%s3467_s0 + $0x68] sm:$0xff]  ;;  %v1749_v32 = vld [vmem:[%s3467_s0 + $0x60] sm:$0xff] }
   0x7   :  { %vm69_vm10 = vcmp.lt.s32.totalorder %v38_v16, 3  ;;  %v36_v18 = vsel %vm35_vm9, %v1673_v9, 0  ;;  %vm41_vm11 = vcmp.gt.s32.totalorder %v1682_v13, 0  ;;  %vm39_vm13 = vcmp.gt.s32.totalorder %v1696_v17, 0  ;;  %v1764_v39 = vld [vmem:[%s3467_s0 + $0x78] sm:$0xff]  ;;  %v1769_v40 = vld [vmem:[%s3467_s0 + $0x70] sm:$0xff] }
   0x8   :  { %vm67_vm12 = vcmp.lt.s32.totalorder %v36_v18, 3  ;;  %v42_v20 = vsel %vm41_vm11, %v1682_v13, 0  ;;  %v1714_v22 = vsel %vm69_vm10, %v38_v16, 3  ;;  %v40_v24 = vsel %vm39_vm13, %v1696_v17, 0 }
   0x9   :  { %v1716_v23 = vsel %vm67_vm12, %v36_v18, 3  ;;  %vm45_vm14 = vcmp.gt.s32.totalorder %v1703_v19, 0  ;;  %vm73_vm15 = vcmp.lt.s32.totalorder %v42_v20, 3  ;;  %vm71_vm0 = vcmp.lt.s32.totalorder %v40_v24, 3 }
   0xa   :  { %200 = vperm.xlu1 %1597, %v1687_v14   ;;  %194 = vperm.xlu0 %1596, %v1689_v15   ;;  %vm43_vm1 = vcmp.gt.s32.totalorder %v1709_v21, 0  ;;  %v46_v27 = vsel %vm45_vm14, %v1703_v19, 0  ;;  %vm49_vm2 = vcmp.gt.s32.totalorder %v1723_v25, 0  ;;  %v1736_v29 = vsel %vm73_vm15, %v42_v20, 3 }
   0xb   :  { %v44_v28 = vsel %vm43_vm1, %v1709_v21, 0  ;;  %v1738_v30 = vsel %vm71_vm0, %v40_v24, 3  ;;  %vm47_vm3 = vcmp.gt.s32.totalorder %v1729_v26, 0  ;;  %vm77_vm4 = vcmp.lt.s32.totalorder %v46_v27, 3 }
   0xc   :  { %vm75_vm5 = vcmp.lt.s32.totalorder %v44_v28, 3  ;;  %v50_v33 = vsel %vm49_vm2, %v1723_v25, 0  ;;  %v48_v34 = vsel %vm47_vm3, %v1729_v26, 0  ;;  %v1456_v35 = vadd.s32 4294967294, %v11_v2 }
   0xd   :  { %v1457_v36 = vadd.s32 4294967294, %v12_v4  ;;  %vm53_vm6 = vcmp.gt.s32.totalorder %v1744_v31, 0  ;;  %vm51_vm7 = vcmp.gt.s32.totalorder %v1749_v32, 0  ;;  %v1757_v37 = vsel %vm77_vm4, %v46_v27, 3 }
   0xe   :  { %206 = vperm.xlu1 %1597, %v1714_v22   ;;  %203 = vperm.xlu0 %1596, %v1716_v23   ;;  %v1759_v38 = vsel %vm75_vm5, %v44_v28, 3  ;;  %vm81_vm8 = vcmp.lt.s32.totalorder %v50_v33, 3  ;;  %vm79_vm9 = vcmp.lt.s32.totalorder %v48_v34, 3  ;;  %v1458_v41 = vadd.s32 4294967294, %v1648_v1 }
   0xf   :  { %v1459_v42 = vadd.s32 4294967294, %v1656_v3  ;;  %v54_v43 = vsel %vm53_vm6, %v1744_v31, 0  ;;  %v52_v44 = vsel %vm51_vm7, %v1749_v32, 0  ;;  %vm57_vm10 = vcmp.gt.s32.totalorder %v1764_v39, 0 }
  0x10   :  { %vm55_vm11 = vcmp.gt.s32.totalorder %v1769_v40, 0  ;;  %vm109_vm12 = vcmp.gt.s32.totalorder %v1457_v36, 0  ;;  %vm107_vm13 = vcmp.gt.s32.totalorder %v1456_v35, 0  ;;  %v1779_v45 = vsel %vm81_vm8, %v50_v33, 3 }
  0x11   :  { %v1781_v46 = vsel %vm79_vm9, %v48_v34, 3  ;;  %vm85_vm14 = vcmp.lt.s32.totalorder %v54_v43, 3  ;;  %vm83_vm15 = vcmp.lt.s32.totalorder %v52_v44, 3  ;;  %v58_v47 = vsel %vm57_vm10, %v1764_v39, 0 }
  0x12   :  { %212 = vperm.xlu1 %1597, %v1736_v29   ;;  %209 = vperm.xlu0 %1596, %v1738_v30   ;;  %v56_v48 = vsel %vm55_vm11, %v1769_v40, 0  ;;  %v110_v49 = vsel %vm109_vm12, %v1457_v36, 0  ;;  %v108_v50 = vsel %vm107_vm13, %v1456_v35, 0  ;;  %v1461_v51 = vadd.s32 4294967294, %v1667_v7 }
  0x13   :  { %v1460_v52 = vadd.s32 4294967294, %v1673_v9  ;;  %vm113_vm0 = vcmp.gt.s32.totalorder %v1459_v42, 0  ;;  %vm111_vm1 = vcmp.gt.s32.totalorder %v1458_v41, 0  ;;  %v1789_v53 = vsel %vm85_vm14, %v54_v43, 3 }
  0x14   :  { %v1791_v54 = vsel %vm83_vm15, %v52_v44, 3  ;;  %vm89_vm2 = vcmp.lt.s32.totalorder %v58_v47, 3  ;;  %vm87_vm3 = vcmp.lt.s32.totalorder %v56_v48, 3  ;;  %vm141_vm4 = vcmp.lt.s32.totalorder %v110_v49, 51 }
  0x15   :  { %vm139_vm5 = vcmp.lt.s32.totalorder %v108_v50, 51  ;;  %v114_v55 = vsel %vm113_vm0, %v1459_v42, 0  ;;  %v112_v56 = vsel %vm111_vm1, %v1458_v41, 0  ;;  %v1463_v57 = vadd.s32 4294967294, %v1682_v13 }
  0x16   :  { %218 = vperm.xlu1 %1597, %v1757_v37   ;;  %215 = vperm.xlu0 %1596, %v1759_v38   ;;  %v1462_v58 = vadd.s32 4294967294, %v1696_v17  ;;  %vm117_vm6 = vcmp.gt.s32.totalorder %v1461_v51, 0  ;;  %vm115_vm7 = vcmp.gt.s32.totalorder %v1460_v52, 0  ;;  %v1797_v59 = vsel %vm89_vm2, %v58_v47, 3 }
  0x17   :  { %v1799_v60 = vsel %vm87_vm3, %v56_v48, 3  ;;  %v142_v61 = vsel %vm141_vm4, %v110_v49, 51  ;;  %v140_v62 = vsel %vm139_vm5, %v108_v50, 51  ;;  %vm145_vm8 = vcmp.lt.s32.totalorder %v114_v55, 51 }
  0x18   :  { %vm143_vm9 = vcmp.lt.s32.totalorder %v112_v56, 51  ;;  %v1465_v63 = vadd.s32 4294967294, %v1703_v19  ;;  %v1464_v0 = vadd.s32 4294967294, %v1709_v21  ;;  %v118_v1 = vsel %vm117_vm6, %v1461_v51, 0 }
  0x19   :  { %v116_v2 = vsel %vm115_vm7, %v1460_v52, 0  ;;  %v1805_v3 = vadd.s32 4, %v142_v61  ;;  %v1807_v4 = vadd.s32 4, %v140_v62  ;;  %vm121_vm10 = vcmp.gt.s32.totalorder %v1463_v57, 0 }
  0x1a   :  { %224 = vperm.xlu1 %1597, %v1779_v45   ;;  %221 = vperm.xlu0 %1596, %v1781_v46   ;;  %vm119_vm11 = vcmp.gt.s32.totalorder %v1462_v58, 0  ;;  %v146_v5 = vsel %vm145_vm8, %v114_v55, 51  ;;  %v144_v6 = vsel %vm143_vm9, %v112_v56, 51  ;;  %vm149_vm12 = vcmp.lt.s32.totalorder %v118_v1, 51 }
  0x1b   :  { %vm147_vm13 = vcmp.lt.s32.totalorder %v116_v2, 51  ;;  %v1467_v7 = vadd.s32 4294967294, %v1723_v25  ;;  %v1466_v8 = vadd.s32 4294967294, %v1729_v26  ;;  %v122_v9 = vsel %vm121_vm10, %v1463_v57, 0 }
  0x1c   :  { %v120_v12 = vsel %vm119_vm11, %v1462_v58, 0  ;;  %v1813_v13 = vadd.s32 4, %v146_v5  ;;  %v1815_v16 = vadd.s32 4, %v144_v6  ;;  %vm125_vm14 = vcmp.gt.s32.totalorder %v1465_v63, 0 }
  0x1d   :  { %vm123_vm15 = vcmp.gt.s32.totalorder %v1464_v0, 0  ;;  %v150_v17 = vsel %vm149_vm12, %v118_v1, 51  ;;  %v148_v18 = vsel %vm147_vm13, %v116_v2, 51  ;;  %vm153_vm0 = vcmp.lt.s32.totalorder %v122_v9, 51 }
  0x1e   :  { %230 = vperm.xlu1 %1597, %v1789_v53   ;;  %227 = vperm.xlu0 %1596, %v1791_v54   ;;  %vm151_vm1 = vcmp.lt.s32.totalorder %v120_v12, 51  ;;  %v1469_v19 = vadd.s32 4294967294, %v1744_v31  ;;  %v1468_v20 = vadd.s32 4294967294, %v1749_v32  ;;  %v126_v21 = vsel %vm125_vm14, %v1465_v63, 0 }
  0x1f   :  { %v124_v24 = vsel %vm123_vm15, %v1464_v0, 0  ;;  %v1821_v25 = vadd.s32 4, %v150_v17  ;;  %v1823_v26 = vadd.s32 4, %v148_v18  ;;  %vm129_vm2 = vcmp.gt.s32.totalorder %v1467_v7, 0 }
  0x20   :  { %vm127_vm3 = vcmp.gt.s32.totalorder %v1466_v8, 0  ;;  %v154_v27 = vsel %vm153_vm0, %v122_v9, 51  ;;  %v152_v28 = vsel %vm151_vm1, %v120_v12, 51  ;;  %vm157_vm4 = vcmp.lt.s32.totalorder %v126_v21, 51 }
  0x21   :  { %vm155_vm5 = vcmp.lt.s32.totalorder %v124_v24, 51  ;;  %v1471_v31 = vadd.s32 4294967294, %v1764_v39  ;;  %v1470_v32 = vadd.s32 4294967294, %v1769_v40  ;;  %v130_v33 = vsel %vm129_vm2, %v1467_v7, 0 }
  0x22   :  { %236 = vperm.xlu1 %1597, %v1797_v59   ;;  %233 = vperm.xlu0 %1596, %v1799_v60   ;;  %v128_v34 = vsel %vm127_vm3, %v1466_v8, 0  ;;  %v1829_v35 = vadd.s32 4, %v154_v27  ;;  %v1831_v36 = vadd.s32 4, %v152_v28  ;;  %vm133_vm6 = vcmp.gt.s32.totalorder %v1469_v19, 0  ;;  %v1214_v27 = vld [vmem:[%s3468_s1] sm:$0xff]  ;;  %v1215_v28 = vld [vmem:[%s3468_s1 + $0x8] sm:$0xff] }
  0x23   :  { %vm131_vm7 = vcmp.gt.s32.totalorder %v1468_v20, 0  ;;  %v158_v41 = vsel %vm157_vm4, %v126_v21, 51  ;;  %v156_v42 = vsel %vm155_vm5, %v124_v24, 51  ;;  %vm161_vm8 = vcmp.lt.s32.totalorder %v130_v33, 51 }
  0x24   :  { %vm159_vm9 = vcmp.lt.s32.totalorder %v128_v34, 51  ;;  %v134_v43 = vsel %vm133_vm6, %v1469_v19, 0  ;;  %v132_v39 = vsel %vm131_vm7, %v1468_v20, 0  ;;  %v1835_v40 = vadd.s32 4, %v158_v41  ;;  %v1217_v41 = vld [vmem:[%s3468_s1 + $0x18] sm:$0xff] }
  0x25   :  { %v1837_v44 = vadd.s32 4, %v156_v42  ;;  %vm137_vm10 = vcmp.gt.s32.totalorder %v1471_v31, 0  ;;  %vm135_vm11 = vcmp.gt.s32.totalorder %v1470_v32, 0  ;;  %v162_v47 = vsel %vm161_vm8, %v130_v33, 51 }
  0x26   :  { %274 = vperm.xlu1 %1597, %v1805_v3   ;;  %271 = vperm.xlu0 %1596, %v1807_v4   ;;  %v160_v48 = vsel %vm159_vm9, %v128_v34, 51  ;;  %vm165_vm12 = vcmp.lt.s32.totalorder %v134_v43, 51  ;;  %vm163_vm13 = vcmp.lt.s32.totalorder %v132_v39, 51  ;;  %v138_v49 = vsel %vm137_vm10, %v1471_v31, 0  ;;  %v1216_v34 = vld [vmem:[%s3468_s1 + $0x10] sm:$0xff] }
  0x27   :  { %v136_v50 = vsel %vm135_vm11, %v1470_v32, 0  ;;  %v1841_v51 = vadd.s32 4, %v162_v47  ;;  %v1843_v52 = vadd.s32 4, %v160_v48  ;;  %v166_v55 = vsel %vm165_vm12, %v134_v43, 51  ;;  %v1218_v47 = vld [vmem:[%s3468_s1 + $0x20] sm:$0xff]  ;;  %v1219_v48 = vld [vmem:[%s3468_s1 + $0x28] sm:$0xff] }
  0x28   :  { %v164_v56 = vsel %vm163_vm13, %v132_v39, 51  ;;  %vm169_vm14 = vcmp.lt.s32.totalorder %v138_v49, 51  ;;  %vm167_vm15 = vcmp.lt.s32.totalorder %v136_v50, 51  ;;  %v1847_v57 = vadd.s32 4, %v166_v55 }
  0x29   :  { %v1849_v58 = vadd.s32 4, %v164_v56  ;;  %v170_v61 = vsel %vm169_vm14, %v138_v49, 51  ;;  %v168_v62 = vsel %vm167_vm15, %v136_v50, 51  ;;  %v383_v1 = vadd.s32 56, %v1689_v15  ;;  %v1220_v56 = vld [vmem:[%s3468_s1 + $0x30] sm:$0xff] }
  0x2a   :  { %280 = vperm.xlu1 %1597, %v1813_v13   ;;  %277 = vperm.xlu0 %1596, %v1815_v16   ;;  %v1853_v63 = vadd.s32 4, %v170_v61  ;;  %v1855_v0 = vadd.s32 4, %v168_v62  ;;  %v382_v2 = vadd.s32 56, %v1677_v11  ;;  %v3472_v5 = vmov 1   ;;  %v1221_v61 = vld [vmem:[%s3468_s1 + $0x38] sm:$0xff] }
  0x2b   :  { %v384_v6 = vadd.s32 56, %v1675_v10  ;;  %v385_v7 = vadd.s32 56, %v1687_v14  ;;  %v386_v8 = vadd.s32 56, %v1716_v23  ;;  %v387_v9 = vadd.s32 56, %v1714_v22 }
  0x2c   :  { %v388_v12 = vadd.s32 56, %v1738_v30  ;;  %v389_v17 = vadd.s32 56, %v1736_v29  ;;  %v390_v18 = vadd.s32 56, %v1759_v38  ;;  %v391_v19 = vadd.s32 56, %v1757_v37 }
  0x2d   :  { %v1626_v20 = vmov 0.0|0.0   ;;  %v392_v21 = vadd.s32 56, %v1781_v46  ;;  %v393_v24 = vadd.s32 56, %v1779_v45  ;;  %v1521_v31 = vpack.c.bf16 %v1215_v28, %v1214_v27  ;;  %v1226_v28 = vld [vmem:[%s3468_s1 + $0x60] sm:$0xff] }
  0x2e   :  { %286 = vperm.xlu1 %1597, %v1821_v25   ;;  %283 = vperm.xlu0 %1596, %v1823_v26   ;;  %v394_v32 = vadd.s32 56, %v1791_v54  ;;  %v395_v33 = vadd.s32 56, %v1789_v53  ;;  %v1524_v42 = vpack.c.bf16 %v1217_v41, %v1216_v34  ;;  %v396_v43 = vadd.s32 56, %v1799_v60  ;;  %v1228_v34 = vld [vmem:[%s3468_s1 + $0x70] sm:$0xff]  ;;  %v1229_v41 = vld [vmem:[%s3468_s1 + $0x78] sm:$0xff] }
  0x2f   :  { %1520 = vmatprep.subr.bf16.mxu0 %v1626_v20  ;;  %1562 = vmatprep.subr.bf16.mxu1 %v1626_v20  ;;  %v397_v39 = vadd.s32 56, %v1797_v59  ;;  %v1527_v49 = vpack.c.bf16 %v1219_v48, %v1218_v47  ;;  %v478_v50 = vadd.s32 56, %v1807_v4  ;;  %v479_v55 = vadd.s32 56, %v1805_v3  ;;  %v1230_v48 = vld [vmem:[%s3468_s1 + $0x80] sm:$0xff] }
  0x30   :  { %1522 = vmatpush1.bf16.msra.mxu0 %v1521_v31  ;;  %1576 = vmatpush1.bf16.msra.mxu1 %v1521_v31  ;;  %v1530_v62 = vpack.c.bf16 %v1221_v61, %v1220_v56  ;;  %v734_v27 = vadd.s32 112, %v1807_v4  ;;  %v1227_v31 = vld [vmem:[%s3468_s1 + $0x68] sm:$0xff]  ;;  %v3477_v47 = vmov 3   ;;  %v484_v56 = vadd.s32 56, %v1831_v36  ;;  %v1232_v61 = vld [vmem:[%s3468_s1 + $0x90] sm:$0xff] }
  0x31   :  { %1523 = vmatprep.subr.bf16.mxu0 %v1626_v20  ;;  %1563 = vmatprep.subr.bf16.mxu1 %v1626_v20 }
  0x32   :  { %292 = vperm.xlu1 %1597, %v1829_v35   ;;  %289 = vperm.xlu0 %1596, %v1831_v36  }
  0x34   :  { %1525 = vmatpush1.bf16.msra.mxu0 %v1524_v42  ;;  %1577 = vmatpush1.bf16.msra.mxu1 %v1524_v42  ;;  %v894_v42 = vadd.s32 168, %v1677_v11 }
  0x35   :  { %1526 = vmatprep.subr.bf16.mxu0 %v1626_v20  ;;  %1564 = vmatprep.subr.bf16.mxu1 %v1626_v20 }
  0x36   :  { %298 = vperm.xlu1 %1597, %v1835_v40   ;;  %295 = vperm.xlu0 %1596, %v1837_v44  }
  0x38   :  { %1528 = vmatpush1.bf16.msra.mxu0 %v1527_v49  ;;  %1578 = vmatpush1.bf16.msra.mxu1 %v1527_v49  ;;  %v1231_v49 = vld [vmem:[%s3468_s1 + $0x88] sm:$0xff] }
  0x39   :  { %1529 = vmatprep.subr.bf16.mxu0 %v1626_v20  ;;  %1565 = vmatprep.subr.bf16.mxu1 %v1626_v20 }
  0x3a   :  { %304 = vperm.xlu1 %1597, %v1841_v51   ;;  %301 = vperm.xlu0 %1596, %v1843_v52  }
  0x3c   :  { %1531 = vmatpush1.bf16.msra.mxu0 %v1530_v62  ;;  %1579 = vmatpush1.bf16.msra.mxu1 %v1530_v62  ;;  %v1233_v62 = vld [vmem:[%s3468_s1 + $0x98] sm:$0xff] }
  0x3d   :  { %1532 = vmatprep.subr.bf16.mxu0 %v1626_v20  ;;  %1566 = vmatprep.subr.bf16.mxu1 %v1626_v20 }
  0x3e   :  { %310 = vperm.xlu1 %1597, %v1847_v57   ;;  %307 = vperm.xlu0 %1596, %v1849_v58  }
  0x42   :  { %316 = vperm.xlu1 %1597, %v1853_v63   ;;  %313 = vperm.xlu0 %1596, %v1855_v0  }
  0x46   :  { %1599 = vset.pattern.permute.xlu1 %v3472_v5  ;;  %1598 = vset.pattern.permute.xlu0 %v3472_v5 }
  0x47   :  { %402 = vperm.xlu1 %1599, %v383_v1   ;;  %399 = vperm.xlu0 %1598, %v382_v2   ;;  %v486_v1 = vadd.s32 56, %v1837_v44  ;;  %v487_v2 = vadd.s32 56, %v1835_v40 }
  0x4b   :  { %405 = vperm.xlu1 %1599, %v384_v6   ;;  %408 = vperm.xlu0 %1598, %v385_v7   ;;  %v1222_v6 = vld [vmem:[%s3468_s1 + $0x40] sm:$0xff]  ;;  %v1223_v7 = vld [vmem:[%s3468_s1 + $0x48] sm:$0xff] }
  0x4f   :  { %411 = vperm.xlu1 %1599, %v386_v8   ;;  %414 = vperm.xlu0 %1598, %v387_v9   ;;  %v1533_v8 = vpack.c.bf16 %v1223_v7, %v1222_v6  ;;  %v480_v9 = vadd.s32 56, %v1815_v16  ;;  %v1234_v6 = vld [vmem:[%s3468_s1 + $0xa0] sm:$0xff]  ;;  %v1235_v7 = vld [vmem:[%s3468_s1 + $0xa8] sm:$0xff] }
  0x51   :  { %1534 = vmatpush1.bf16.msra.mxu0 %v1533_v8  ;;  %1580 = vmatpush1.bf16.msra.mxu1 %v1533_v8  ;;  %v639_v8 = vadd.s32 112, %v1689_v15 }
  0x52   :  { %1535 = vmatprep.subr.bf16.mxu0 %v1626_v20  ;;  %1567 = vmatprep.subr.bf16.mxu1 %v1626_v20 }
  0x53   :  { %417 = vperm.xlu1 %1599, %v388_v12   ;;  %420 = vperm.xlu0 %1598, %v389_v17   ;;  %v646_v12 = vadd.s32 112, %v1759_v38  ;;  %v1224_v17 = vld [vmem:[%s3468_s1 + $0x50] sm:$0xff] }
  0x57   :  { %423 = vperm.xlu1 %1599, %v390_v18   ;;  %426 = vperm.xlu0 %1598, %v391_v19   ;;  %v1225_v18 = vld [vmem:[%s3468_s1 + $0x58] sm:$0xff] }
  0x58   :  { %v1536_v19 = vpack.c.bf16 %v1225_v18, %v1224_v17 }
  0x5a   :  { %1537 = vmatpush1.bf16.msra.mxu0 %v1536_v19  ;;  %1581 = vmatpush1.bf16.msra.mxu1 %v1536_v19  ;;  %v1236_v19 = vld [vmem:[%s3468_s1 + $0xb0] sm:$0xff] }
  0x5b   :  { %429 = vperm.xlu1 %1599, %v392_v21   ;;  %432 = vperm.xlu0 %1598, %v393_v24   ;;  %v3470_v21 = vmov 2   ;;  %v489_v24 = vadd.s32 56, %v1841_v51 }
  0x5c   :  { %1538 = vmatprep.subr.bf16.mxu0 %v1626_v20  ;;  %1568 = vmatprep.subr.bf16.mxu1 %v1626_v20 }
  0x5f   :  { %435 = vperm.xlu1 %1599, %v394_v32   ;;  %438 = vperm.xlu0 %1598, %v395_v33   ;;  %v1539_v32 = vpack.c.bf16 %v1227_v31, %v1226_v28  ;;  %v482_v33 = vadd.s32 56, %v1823_v26  ;;  %v742_v28 = vadd.s32 112, %v1837_v44 }
  0x61   :  { %1540 = vmatpush1.bf16.msra.mxu0 %v1539_v32  ;;  %1582 = vmatpush1.bf16.msra.mxu1 %v1539_v32 }
  0x62   :  { %1541 = vmatprep.subr.bf16.mxu0 %v1626_v20  ;;  %1569 = vmatprep.subr.bf16.mxu1 %v1626_v20 }
  0x63   :  { %441 = vperm.xlu1 %1599, %v396_v43   ;;  %444 = vperm.xlu0 %1598, %v397_v39   ;;  %v1542_v43 = vpack.c.bf16 %v1229_v41, %v1228_v34  ;;  %v491_v39 = vadd.s32 56, %v1847_v57  ;;  %v1239_v34 = vld [vmem:[%s3468_s1 + $0xc8] sm:$0xff]  ;;  %v743_v41 = vadd.s32 112, %v1835_v40 }
  0x65   :  { %1543 = vmatpush1.bf16.msra.mxu0 %v1542_v43  ;;  %1583 = vmatpush1.bf16.msra.mxu1 %v1542_v43  ;;  %v1240_v43 = vld [vmem:[%s3468_s1 + $0xd0] sm:$0xff] }
  0x66   :  { %1544 = vmatprep.subr.bf16.mxu0 %v1626_v20  ;;  %1570 = vmatprep.subr.bf16.mxu1 %v1626_v20 }
  0x67   :  { %495 = vperm.xlu1 %1599, %v478_v50   ;;  %498 = vperm.xlu0 %1598, %v479_v55   ;;  %v990_v50 = vadd.s32 168, %v1807_v4  ;;  %v1545_v55 = vpack.c.bf16 %v1231_v49, %v1230_v48  ;;  %v998_v4 = vadd.s32 168, %v1837_v44 }
  0x69   :  { %1546 = vmatpush1.bf16.msra.mxu0 %v1545_v55  ;;  %1584 = vmatpush1.bf16.msra.mxu1 %v1545_v55  ;;  %v895_v55 = vadd.s32 168, %v1689_v15  ;;  %v737_v15 = vadd.s32 112, %v1813_v13 }
  0x6a   :  { %1547 = vmatprep.subr.bf16.mxu0 %v1626_v20  ;;  %1571 = vmatprep.subr.bf16.mxu1 %v1626_v20 }
  0x6b   :  { %519 = vperm.xlu1 %1599, %v486_v1   ;;  %522 = vperm.xlu0 %1598, %v487_v2   ;;  %v1548_v1 = vpack.c.bf16 %v1233_v62, %v1232_v61  ;;  %v493_v2 = vadd.s32 56, %v1853_v63 }
  0x6d   :  { %1549 = vmatpush1.bf16.msra.mxu0 %v1548_v1  ;;  %1585 = vmatpush1.bf16.msra.mxu1 %v1548_v1 }
  0x6e   :  { %1550 = vmatprep.subr.bf16.mxu0 %v1626_v20  ;;  %1572 = vmatprep.subr.bf16.mxu1 %v1626_v20 }
  0x6f   :  { %1600 = vset.pattern.permute.xlu1 %v3470_v21  ;;  %501 = vperm.xlu0 %1598, %v480_v9   ;;  %v1551_v9 = vpack.c.bf16 %v1235_v7, %v1234_v6  ;;  %v650_v6 = vadd.s32 112, %v1791_v54 }
  0x70   :  { %679 = vperm.xlu1 %1600, %v646_v12   ;;  %v638_v12 = vadd.s32 112, %v1677_v11  ;;  %v647_v11 = vadd.s32 112, %v1757_v37 }
  0x71   :  { %1552 = vmatpush1.bf16.msra.mxu0 %v1551_v9  ;;  %1586 = vmatpush1.bf16.msra.mxu1 %v1551_v9  ;;  %v739_v9 = vadd.s32 112, %v1821_v25 }
  0x72   :  { %1553 = vmatprep.subr.bf16.mxu0 %v1626_v20  ;;  %1573 = vmatprep.subr.bf16.mxu1 %v1626_v20 }
  0x73   :  { %528 = vperm.xlu0 %1598, %v489_v24   ;;  %v1237_v24 = vld [vmem:[%s3468_s1 + $0xb8] sm:$0xff] }
  0x74   :  { %751 = vperm.xlu1 %1600, %v734_v27   ;;  %v1554_v27 = vpack.c.bf16 %v1237_v24, %v1236_v19 }
  0x76   :  { %1555 = vmatpush1.bf16.msra.mxu0 %v1554_v27  ;;  %1587 = vmatpush1.bf16.msra.mxu1 %v1554_v27  ;;  %v640_v27 = vadd.s32 112, %v1675_v10 }
  0x77   :  { %507 = vperm.xlu0 %1598, %v482_v33   ;;  %v1238_v33 = vld [vmem:[%s3468_s1 + $0xc0] sm:$0xff]  ;;  %1556 = vmatprep.subr.bf16.mxu0 %v1626_v20 }
  0x78   :  { %1601 = vset.pattern.permute.xlu1 %v3477_v47  ;;  %v1557_v44 = vpack.c.bf16 %v1239_v34, %v1238_v33  ;;  %1574 = vmatprep.subr.bf16.mxu1 %v1626_v20 }
  0x79   :  { %911 = vperm.xlu1 %1601, %v894_v42   ;;  %v735_v42 = vadd.s32 112, %v1805_v3 }
  0x7a   :  { %1558 = vmatpush1.bf16.msra.mxu0 %v1557_v44  ;;  %1588 = vmatpush1.bf16.msra.mxu1 %v1557_v44  ;;  %v187_v44 = vlaneseq }
  0x7b   :  { %534 = vperm.xlu0 %1598, %v491_v39   ;;  %v1241_v39 = vld [vmem:[%s3468_s1 + $0xd8] sm:$0xff]  ;;  %1559 = vmatprep.subr.bf16.mxu0 %v1626_v20 }
  0x7c   :  { %1575 = vmatprep.subr.bf16.mxu1 %v1626_v20  ;;  %v999_v20 = vadd.s32 168, %v1835_v40  ;;  %v652_v40 = vadd.s32 112, %v1799_v60 }
  0x7d   :  { %1007 = vperm.xlu1 %1601, %v990_v50   ;;  %v1560_v50 = vpack.c.bf16 %v1241_v39, %v1240_v43  ;;  %v744_v39 = vadd.s32 112, %v1843_v52 }
  0x7f   :  { %513 = vperm.xlu0 %1598, %v484_v56   ;;  %v648_v56 = vadd.s32 112, %v1781_v46  ;;  %1561 = vmatpush1.bf16.msra.mxu0 %v1560_v50 }
  0x80   :  { %1589 = vmatpush1.bf16.msra.mxu1 %v1560_v50  ;;  %v902_v50 = vadd.s32 168, %v1759_v38 }
  0x81   :  { %1031 = vperm.xlu1 %1601, %v998_v4   ;;  %v991_v4 = vadd.s32 168, %v1805_v3  ;;  %v488_v3 = vadd.s32 56, %v1843_v52 }
  0x83   :  { %540 = vperm.xlu0 %1598, %v493_v2  }
  0x85   :  { %v1984_v17 = vpop.permute.xlu1 %197  ;;  %v1986_v18 = vpop.permute.xlu0 %191  ;;  %1602 = vset.pattern.permute.xlu1 %v3470_v21 }
  0x86   :  { %658 = vperm.xlu1 %1602, %v639_v8  }
  0x87   :  { %1620 = vset.pattern.permute.xlu0 %v3470_v21 }
  0x88   :  { %655 = vperm.xlu0 %1620, %v638_v12  }
  0x89   :  { %v2000_v31 = vpop.permute.xlu1 %200  ;;  %v2002_v32 = vpop.permute.xlu0 %194 }
  0x8a   :  { %682 = vperm.xlu1 %1602, %v647_v11  }
  0x8c   :  { %775 = vperm.xlu0 %1620, %v742_v28   ;;  %v741_v28 = vadd.s32 112, %v1829_v35 }
  0x8d   :  { %v2020_v48 = vpop.permute.xlu1 %206  ;;  %v2022_v49 = vpop.permute.xlu0 %203 }
  0x8e   :  { %3533 = vst [vmem:[#allocation2_spill] sm:$0xff] %v2020_v48  ;;  %778 = vperm.xlu1 %1602, %v743_v41   ;;  %v736_v41 = vadd.s32 112, %v1815_v16 }
  0x90   :  { %754 = vperm.xlu0 %1620, %v735_v42  }
  0x91   :  { %v2028_v61 = vpop.permute.xlu1 %212  ;;  %v2030_v62 = vpop.permute.xlu0 %209 }
  0x92   :  { %3534 = vst [vmem:[#allocation3_spill] sm:$0xff] %v2028_v61  ;;  %1603 = vset.pattern.permute.xlu1 %v3477_v47 }
  0x93   :  { %914 = vperm.xlu1 %1603, %v895_v55   ;;  %v2072_v55 = vand.u32 127, %v187_v44  ;;  %v905_v44 = vadd.s32 168, %v1779_v45 }
  0x94   :  { %685 = vperm.xlu0 %1620, %v648_v56  }
  0x95   :  { %v2035_v1 = vpop.permute.xlu1 %218  ;;  %v2037_v2 = vpop.permute.xlu0 %215  ;;  %vm250_vm0 = vcmp.eq.s32.totalorder %v2072_v55, %v2030_v62 }
  0x96   :  { %vm254_vm5 = vcmp.eq.s32.totalorder %v2072_v55, %v2037_v2 }
  0x97   :  { %1010 = vperm.xlu1 %1603, %v991_v4  }
  0x98   :  { %760 = vperm.xlu0 %1620, %v737_v15   ;;  %v903_v15 = vadd.s32 168, %v1757_v37  ;;  %v992_v37 = vadd.s32 168, %v1815_v16  ;;  %v3541_v16 = vmov 0 }
  0x99   :  { %v2041_v7 = vpop.permute.xlu1 %224  ;;  %v2043_v8 = vpop.permute.xlu0 %221 }
  0x9a   :  { %vm258_vm11 = vcmp.eq.s32.totalorder %v2072_v55, %v2043_v8 }
  0x9b   :  { %1034 = vperm.xlu1 %1603, %v999_v20   ;;  %v904_v20 = vadd.s32 168, %v1781_v46  ;;  %v3539_v46 = vmov 0 }
  0x9c   :  { %691 = vperm.xlu0 %1620, %v650_v6   ;;  %v2081_v6 = vadd.s32 128, %v2072_v55 }
  0x9d   :  { %v2047_v12 = vpop.permute.xlu1 %230  ;;  %v2049_v19 = vpop.permute.xlu0 %227 }
  0x9e   :  { %3535 = vst [vmem:[#allocation4_spill] sm:$0xff] %v2047_v12  ;;  %vm251_vm2 = vcmp.eq.s32.totalorder %v2081_v6, %v2030_v62  ;;  %vm255_vm8 = vcmp.eq.s32.totalorder %v2081_v6, %v2037_v2  ;;  %v481_v62 = vadd.s32 56, %v1813_v13  ;;  %vm259_vm14 = vcmp.eq.s32.totalorder %v2081_v6, %v2043_v8 }
  0x9f   :  { %1604 = vset.pattern.permute.xlu1 %v3472_v5  ;;  %v641_v2 = vadd.s32 112, %v1687_v14  ;;  %v3550_v8 = vmov 0  ;;  %v746_v12 = vadd.s32 112, %v1849_v58 }
  0xa0   :  { %525 = vperm.xlu1 %1604, %v488_v3   ;;  %766 = vperm.xlu0 %1620, %v739_v9   ;;  %v896_v9 = vadd.s32 168, %v1675_v10 }
  0xa1   :  { %v2053_v24 = vpop.permute.xlu1 %236  ;;  %v2055_v11 = vpop.permute.xlu0 %233 }
  0xa2   :  { %3536 = vst [vmem:[#allocation5_spill] sm:$0xff] %v2053_v24 }
  0xa4   :  { %1605 = vset.pattern.permute.xlu1 %v3470_v21  ;;  %697 = vperm.xlu0 %1620, %v652_v40  }
  0xa5   :  { %v2060_v33 = vpop.permute.xlu1 %274  ;;  %v2062_v34 = vpop.permute.xlu0 %271  ;;  %661 = vperm.xlu1 %1605, %v640_v27   ;;  %v1000_v27 = vadd.s32 168, %v1843_v52 }
  0xa8   :  { %772 = vperm.xlu0 %1620, %v741_v28   ;;  %v3543_v28 = vmov 0 }
  0xa9   :  { %v2065_v42 = vpop.permute.xlu1 %280  ;;  %v2067_v43 = vpop.permute.xlu0 %277  ;;  %757 = vperm.xlu1 %1605, %v736_v41  }
  0xac   :  { %1622 = vset.pattern.permute.xlu0 %v3477_v47 }
  0xad   :  { %v2074_v56 = vpop.permute.xlu1 %286  ;;  %781 = vperm.xlu1 %1605, %v744_v39   ;;  %935 = vperm.xlu0 %1622, %v902_v50   ;;  %v2076_v4 = vpop.permute.xlu0 %283  ;;  %v3545_v39 = vmov 0  ;;  %v3547_v50 = vmov 0 }
  0xae   :  { %3537 = vst [vmem:[#allocation6_spill] sm:$0xff] %v2074_v56  ;;  %v3592_v56 = vmov 0 }
  0xb1   :  { %v2083_v3 = vpop.permute.xlu1 %292  ;;  %1606 = vset.pattern.permute.xlu1 %v3477_v47  ;;  %938 = vperm.xlu0 %1622, %v903_v15   ;;  %v290_v38 = vpop.permute.xlu0 %289 }
  0xb2   :  { %3538 = vst [vmem:[#allocation7_spill] sm:$0xff] %v2083_v3  ;;  %vm330_vm1 = vcmp.eq.s32.totalorder %v2072_v55, %v290_v38  ;;  %941 = vperm.xlu1 %1606, %v904_v20   ;;  %vm331_vm3 = vcmp.eq.s32.totalorder %v2081_v6, %v290_v38  ;;  %v898_v38 = vadd.s32 168, %v1716_v23 }
  0xb3   :  { %vm2094_vm4 = vmor %vm250_vm0, %vm330_vm1  ;;  %vm262_vm1 = vcmp.eq.s32.totalorder %v2072_v55, %v2049_v19 }
  0xb4   :  { %v3540_v46 = vsel %vm2094_vm4, 4294967295, %v3539_v46  ;;  %vm2103_vm6 = vmor %vm251_vm2, %vm331_vm3 }
  0xb5   :  { %v2098_v40 = vpop.permute.xlu1 %298  ;;  %917 = vperm.xlu0 %1622, %v896_v9   ;;  %v296_v10 = vpop.permute.xlu0 %295  ;;  %v3542_v16 = vsel %vm2103_vm6, 4294967295, %v3541_v16  ;;  %v649_v9 = vadd.s32 112, %v1779_v45  ;;  %v745_v45 = vadd.s32 112, %v1841_v51 }
  0xb6   :  { %vm334_vm7 = vcmp.eq.s32.totalorder %v2072_v55, %v296_v10  ;;  %1013 = vperm.xlu1 %1606, %v992_v37   ;;  %vm335_vm9 = vcmp.eq.s32.totalorder %v2081_v6, %v296_v10  ;;  %v3552_v37 = vmov 0 }
  0xb7   :  { %vm2112_vm10 = vmor %vm254_vm5, %vm334_vm7  ;;  %vm263_vm5 = vcmp.eq.s32.totalorder %v2081_v6, %v2049_v19  ;;  %v3556_v19 = vmov 0 }
  0xb8   :  { %v3544_v28 = vsel %vm2112_vm10, 4294967295, %v3543_v28  ;;  %vm2121_vm12 = vmor %vm255_vm8, %vm335_vm9  ;;  %vm266_vm9 = vcmp.eq.s32.totalorder %v2072_v55, %v2055_v11 }
  0xb9   :  { %v2116_v52 = vpop.permute.xlu1 %304  ;;  %1037 = vperm.xlu0 %1622, %v1000_v27   ;;  %v302_v41 = vpop.permute.xlu0 %301  ;;  %v3546_v39 = vsel %vm2121_vm12, 4294967295, %v3545_v39  ;;  %vm247_vm12 = vcmp.eq.s32.totalorder %v2081_v6, %v2022_v49 }
  0xba   :  { %vm338_vm13 = vcmp.eq.s32.totalorder %v2072_v55, %v302_v41  ;;  %1607 = vset.pattern.permute.xlu1 %v3472_v5  ;;  %vm339_vm15 = vcmp.eq.s32.totalorder %v2081_v6, %v302_v41  ;;  %v3559_v41 = vmov 0  ;;  %v1004_v5 = vadd.s32 168, %v1855_v0 }
  0xbb   :  { %504 = vperm.xlu1 %1607, %v481_v62   ;;  %vm2131_vm0 = vmor %vm258_vm11, %vm338_vm13  ;;  %v1002_v62 = vadd.s32 168, %v1849_v58 }
  0xbc   :  { %v3548_v50 = vsel %vm2131_vm0, 4294967295, %v3547_v50  ;;  %vm2140_vm2 = vmor %vm259_vm14, %vm339_vm15  ;;  %vm267_vm14 = vcmp.eq.s32.totalorder %v2081_v6, %v2055_v11  ;;  %v897_v11 = vadd.s32 168, %v1687_v14  ;;  %v1001_v14 = vadd.s32 168, %v1841_v51 }
  0xbd   :  { %v2135_v15 = vpop.permute.xlu1 %310  ;;  %v308_v20 = vpop.permute.xlu0 %307  ;;  %944 = vperm.xlu0 %1622, %v905_v44   ;;  %v3551_v8 = vsel %vm2140_vm2, 4294967295, %v3550_v8  ;;  %v907_v44 = vadd.s32 168, %v1789_v53  ;;  %vm243_vm0 = vcmp.eq.s32.totalorder %v2081_v6, %v1984_v17 }
  0xbe   :  { %3549 = vst [vmem:[#allocation8_spill] sm:$0xff] %v2135_v15  ;;  %vm342_vm3 = vcmp.eq.s32.totalorder %v2072_v55, %v308_v20  ;;  %vm343_vm7 = vcmp.eq.s32.totalorder %v2081_v6, %v308_v20 }
  0xbf   :  { %1608 = vset.pattern.permute.xlu1 %v3470_v21  ;;  %vm2150_vm8 = vmor %vm262_vm1, %vm342_vm3 }
  0xc0   :  { %664 = vperm.xlu1 %1608, %v641_v2   ;;  %v3553_v37 = vsel %vm2150_vm8, 4294967295, %v3552_v37  ;;  %vm2159_vm11 = vmor %vm263_vm5, %vm343_vm7  ;;  %v3562_v2 = vmov 0 }
  0xc1   :  { %3554 = vst [vmem:[#allocation9_spill] sm:$0xff] %v3553_v37  ;;  %v2154_v10 = vpop.permute.xlu1 %316  ;;  %v314_v27 = vpop.permute.xlu0 %313  ;;  %923 = vperm.xlu0 %1622, %v898_v38   ;;  %v3557_v19 = vsel %vm2159_vm11, 4294967295, %v3556_v19  ;;  %v3595_v37 = vmov 0 }
  0xc2   :  { %3555 = vst [vmem:[#allocation10_spill] sm:$0xff] %v2154_v10  ;;  %3558 = vst [vmem:[#allocation11_spill] sm:$0xff] %v3557_v19  ;;  %vm346_vm13 = vcmp.eq.s32.totalorder %v2072_v55, %v314_v27  ;;  %vm347_vm15 = vcmp.eq.s32.totalorder %v2081_v6, %v314_v27  ;;  %v651_v19 = vadd.s32 112, %v1789_v53 }
  0xc3   :  { %vm2168_vm1 = vmor %vm266_vm9, %vm346_vm13 }
  0xc4   :  { %688 = vperm.xlu1 %1608, %v649_v9   ;;  %v3560_v41 = vsel %vm2168_vm1, 4294967295, %v3559_v41  ;;  %vm2173_vm3 = vmor %vm267_vm14, %vm347_vm15  ;;  %v900_v9 = vadd.s32 168, %v1738_v30  ;;  %vm322_vm14 = vcmp.eq.s32.totalorder %v2072_v55, %v2067_v43  ;;  %vm323_vm15 = vcmp.eq.s32.totalorder %v2081_v6, %v2067_v43 }
  0xc5   :  { %3561 = vst [vmem:[#allocation12_spill] sm:$0xff] %v3560_v41  ;;  %1043 = vperm.xlu0 %1622, %v1002_v62   ;;  %v3563_v2 = vsel %vm2173_vm3, 4294967295, %v3562_v2  ;;  %v993_v62 = vadd.s32 168, %v1813_v13  ;;  %vm242_vm1 = vcmp.eq.s32.totalorder %v2072_v55, %v1984_v17  ;;  %v3577_v43 = vmov 0 }
  0xc6   :  { %3564 = vst [vmem:[#allocation13_spill] sm:$0xff] %v3563_v2  ;;  %v2177_v20 = vpop.permute.xlu1 %402  ;;  %v2179_v38 = vpop.permute.xlu0 %399  ;;  %v3568_v2 = vmov 2   ;;  %vm2250_vm2 = vmor %vm242_vm1, %vm322_vm14  ;;  %v3579_v17 = vmov 0 }
  0xc8   :  { %784 = vperm.xlu1 %1608, %v745_v45  }
  0xc9   :  { %950 = vperm.xlu0 %1622, %v907_v44   ;;  %v909_v44 = vadd.s32 168, %v1797_v59 }
  0xca   :  { %v2183_v27 = vpop.permute.xlu1 %405  ;;  %v2185_v21 = vpop.permute.xlu0 %408 }
  0xcc   :  { %1609 = vset.pattern.permute.xlu1 %v3477_v47  ;;  %v3567_v47 = vmov 1  }
  0xcd   :  { %920 = vperm.xlu1 %1609, %v897_v11   ;;  %929 = vperm.xlu0 %1622, %v900_v9   ;;  %v490_v9 = vadd.s32 56, %v1849_v58  ;;  %v994_v58 = vadd.s32 168, %v1823_v26 }
  0xce   :  { %v2190_v24 = vpop.permute.xlu1 %411  ;;  %v2192_v45 = vpop.permute.xlu0 %414 }
  0xcf   :  { %3565 = vst [vmem:[#allocation14_spill] sm:$0xff] %v2192_v45 }
  0xd1   :  { %1016 = vperm.xlu1 %1609, %v993_v62   ;;  %1049 = vperm.xlu0 %1622, %v1004_v5   ;;  %v642_v5 = vadd.s32 112, %v1716_v23  ;;  %v906_v23 = vadd.s32 168, %v1791_v54  ;;  %v3571_v54 = vmov 0 }
  0xd2   :  { %v2196_v10 = vpop.permute.xlu1 %417  ;;  %v2198_v61 = vpop.permute.xlu0 %420 }
  0xd3   :  { %3566 = vst [vmem:[#allocation15_spill] sm:$0xff] %v2198_v61 }
  0xd5   :  { %1040 = vperm.xlu1 %1609, %v1001_v14   ;;  %956 = vperm.xlu0 %1622, %v909_v44   ;;  %v738_v14 = vadd.s32 112, %v1823_v26 }
  0xd6   :  { %v2200_v13 = vpop.permute.xlu1 %423  ;;  %v427_v11 = vpop.permute.xlu0 %426 }
  0xd7   :  { %vm464_vm5 = vcmp.eq.s32.totalorder %v2072_v55, %v427_v11  ;;  %vm465_vm9 = vcmp.eq.s32.totalorder %v2081_v6, %v427_v11  ;;  %v3573_v11 = vmov 0 }
  0xd9   :  { %1610 = vset.pattern.permute.xlu1 %v3567_v47 }
  0xda   :  { %v2204_v3 = vpop.permute.xlu1 %429  ;;  %531 = vperm.xlu1 %1610, %v490_v9   ;;  %v433_v51 = vpop.permute.xlu0 %432 }
  0xdb   :  { %vm468_vm1 = vcmp.eq.s32.totalorder %v2072_v55, %v433_v51 }
  0xde   :  { %v2207_v62 = vpop.permute.xlu1 %435  ;;  %1611 = vset.pattern.permute.xlu1 %v3568_v2  ;;  %v2210_v61 = vpop.permute.xlu0 %438 }
  0xdf   :  { %667 = vperm.xlu1 %1611, %v642_v5   ;;  %v3570_v5 = vmov 3  }
  0xe2   :  { %v2213_v44 = vpop.permute.xlu1 %441  ;;  %v2215_v41 = vpop.permute.xlu0 %444 }
  0xe3   :  { %3569 = vst [vmem:[#allocation16_spill] sm:$0xff] %v2213_v44  ;;  %763 = vperm.xlu1 %1611, %v738_v14   ;;  %v483_v14 = vadd.s32 56, %v1821_v25  ;;  %v3585_v44 = vmov 0 }
  0xe6   :  { %v2218_v9 = vpop.permute.xlu1 %495  ;;  %v2220_v15 = vpop.permute.xlu0 %498 }
  0xe7   :  { %787 = vperm.xlu1 %1611, %v746_v12  }
  0xea   :  { %v2223_v45 = vpop.permute.xlu1 %519  ;;  %v523_v48 = vpop.permute.xlu0 %522 }
  0xeb   :  { %vm560_vm7 = vcmp.eq.s32.totalorder %v2072_v55, %v523_v48  ;;  %1612 = vset.pattern.permute.xlu1 %v3570_v5  ;;  %vm561_vm13 = vcmp.eq.s32.totalorder %v2081_v6, %v523_v48  ;;  %v3575_v48 = vmov 0 }
  0xec   :  { %947 = vperm.xlu1 %1612, %v906_v23   ;;  %vm2235_vm3 = vmor %vm464_vm5, %vm560_vm7  ;;  %v3576_v48 = vsel %vm2250_vm2, 4294967295, %v3575_v48 }
  0xed   :  { %v3572_v54 = vsel %vm2235_vm3, 4294967295, %v3571_v54  ;;  %vm2241_vm11 = vmor %vm465_vm9, %vm561_vm13  ;;  %vm450_vm9 = vcmp.eq.s32.totalorder %v2072_v55, %v2183_v27  ;;  %vm451_vm13 = vcmp.eq.s32.totalorder %v2081_v6, %v2183_v27  ;;  %v3583_v27 = vmov 0 }
  0xee   :  { %v502_v12 = vpop.permute.xlu0 %501  ;;  %v3574_v11 = vsel %vm2241_vm11, 4294967295, %v3573_v11  ;;  %vm2255_vm7 = vmor %vm243_vm0, %vm323_vm15  ;;  %vm469_vm15 = vcmp.eq.s32.totalorder %v2081_v6, %v433_v51 }
  0xef   :  { %vm546_vm8 = vcmp.eq.s32.totalorder %v2072_v55, %v502_v12  ;;  %v2246_v26 = vpop.permute.xlu1 %679  ;;  %vm547_vm5 = vcmp.eq.s32.totalorder %v2081_v6, %v502_v12  ;;  %v3578_v43 = vsel %vm2255_vm7, 4294967295, %v3577_v43 }
  0xf0   :  { %1019 = vperm.xlu1 %1612, %v994_v58   ;;  %vm2264_vm3 = vmor %vm450_vm9, %vm546_vm8  ;;  %v3581_v58 = vmov 0  ;;  %vm327_vm8 = vcmp.eq.s32.totalorder %v2081_v6, %v2076_v4 }
  0xf1   :  { %v3580_v17 = vsel %vm2264_vm3, 4294967295, %v3579_v17  ;;  %vm2269_vm14 = vmor %vm451_vm13, %vm547_vm5  ;;  %vm246_vm5 = vcmp.eq.s32.totalorder %v2072_v55, %v2022_v49  ;;  %vm326_vm13 = vcmp.eq.s32.totalorder %v2072_v55, %v2076_v4  ;;  %v3590_v4 = vmov 0 }
  0xf2   :  { %v529_v23 = vpop.permute.xlu0 %528  ;;  %v3582_v58 = vsel %vm2269_vm14, 4294967295, %v3581_v58  ;;  %vm2305_vm14 = vmor %vm246_vm5, %vm326_vm13  ;;  %vm473_vm13 = vcmp.eq.s32.totalorder %v2081_v6, %v2210_v61 }
  0xf3   :  { %vm564_vm0 = vcmp.eq.s32.totalorder %v2072_v55, %v529_v23  ;;  %v2274_v12 = vpop.permute.xlu1 %751  ;;  %vm565_vm9 = vcmp.eq.s32.totalorder %v2081_v6, %v529_v23  ;;  %v643_v23 = vadd.s32 112, %v1714_v22 }
  0xf4   :  { %1613 = vset.pattern.permute.xlu1 %v3567_v47  ;;  %vm2295_vm3 = vmor %vm468_vm1, %vm564_vm0  ;;  %vm454_vm0 = vcmp.eq.s32.totalorder %v2072_v55, %v2190_v24 }
  0xf5   :  { %510 = vperm.xlu1 %1613, %v483_v14   ;;  %v3584_v27 = vsel %vm2295_vm3, 4294967295, %v3583_v27  ;;  %vm2300_vm2 = vmor %vm469_vm15, %vm565_vm9  ;;  %v3587_v14 = vmov 0  ;;  %vm455_vm15 = vcmp.eq.s32.totalorder %v2081_v6, %v2190_v24  ;;  %v3597_v24 = vmov 0 }
  0xf6   :  { %v508_v51 = vpop.permute.xlu0 %507  ;;  %v3586_v44 = vsel %vm2300_vm2, 4294967295, %v3585_v44  ;;  %v3588_v14 = vsel %vm2305_vm14, 4294967295, %v3587_v14  ;;  %vm2312_vm1 = vmor %vm247_vm12, %vm327_vm8  ;;  %vm472_vm12 = vcmp.eq.s32.totalorder %v2072_v55, %v2210_v61  ;;  %vm544_vm14 = vcmp.eq.s32.totalorder %v2072_v55, %v2220_v15 }
  0xf7   :  { %vm550_vm10 = vcmp.eq.s32.totalorder %v2072_v55, %v508_v51  ;;  %3589 = vst [vmem:[#allocation17_spill] sm:$0xff] %v3588_v14  ;;  %vm551_vm7 = vcmp.eq.s32.totalorder %v2081_v6, %v508_v51  ;;  %v3591_v4 = vsel %vm2312_vm1, 4294967295, %v3590_v4  ;;  %vm543_vm2 = vcmp.eq.s32.totalorder %v2081_v6, %v2218_v9 }
  0xf8   :  { %v2310_v49 = vpop.permute.xlu1 %911  ;;  %vm2321_vm9 = vmor %vm454_vm0, %vm550_vm10 }
  0xf9   :  { %1614 = vset.pattern.permute.xlu1 %v3568_v2  ;;  %v3593_v56 = vsel %vm2321_vm9, 4294967295, %v3592_v56  ;;  %vm2328_vm8 = vmor %vm455_vm15, %vm551_vm7 }
  0xfa   :  { %3594 = vst [vmem:[#allocation18_spill] sm:$0xff] %v3593_v56  ;;  %670 = vperm.xlu1 %1614, %v643_v23   ;;  %v535_v51 = vpop.permute.xlu0 %534  ;;  %v3596_v37 = vsel %vm2328_vm8, 4294967295, %v3595_v37  ;;  %v747_v23 = vadd.s32 112, %v1847_v57  ;;  %v3600_v56 = vmov 0 }
  0xfb   :  { %vm568_vm5 = vcmp.eq.s32.totalorder %v2072_v55, %v535_v51  ;;  %vm569_vm0 = vcmp.eq.s32.totalorder %v2081_v6, %v535_v51 }
  0xfc   :  { %v2340_v53 = vpop.permute.xlu1 %1007  ;;  %vm2346_vm15 = vmor %vm472_vm12, %vm568_vm5  ;;  %vm458_vm12 = vcmp.eq.s32.totalorder %v2072_v55, %v2196_v10  ;;  %vm459_vm5 = vcmp.eq.s32.totalorder %v2081_v6, %v2196_v10  ;;  %v3608_v10 = vmov 0 }
  0xfd   :  { %v3598_v24 = vsel %vm2346_vm15, 4294967295, %v3597_v24  ;;  %vm2351_vm3 = vmor %vm473_vm13, %vm569_vm0  ;;  %vm476_vm13 = vcmp.eq.s32.totalorder %v2072_v55, %v2215_v41  ;;  %vm477_vm15 = vcmp.eq.s32.totalorder %v2081_v6, %v2215_v41 }
  0xfe   :  { %3599 = vst [vmem:[#allocation19_spill] sm:$0xff] %v3598_v24  ;;  %694 = vperm.xlu1 %1614, %v651_v19   ;;  %v514_v61 = vpop.permute.xlu0 %513  ;;  %v3601_v56 = vsel %vm2351_vm3, 4294967295, %v3600_v56  ;;  %v3603_v19 = vmov 0  ;;  %v3606_v24 = vmov 0 }
  0xff   :  { %3602 = vst [vmem:[#allocation20_spill] sm:$0xff] %v3601_v56  ;;  %vm554_vm10 = vcmp.eq.s32.totalorder %v2072_v55, %v514_v61  ;;  %vm555_vm9 = vcmp.eq.s32.totalorder %v2081_v6, %v514_v61  ;;  %v899_v56 = vadd.s32 168, %v1714_v22  ;;  %v995_v61 = vadd.s32 168, %v1821_v25 }
 0x100   :  { %v2356_v51 = vpop.permute.xlu1 %1031  ;;  %vm2363_vm7 = vmor %vm458_vm12, %vm554_vm10  ;;  %vm241_vm10 = vcmp.eq.s32.totalorder %v2081_v6, %v2002_v32 }
 0x101   :  { %v3604_v19 = vsel %vm2363_vm7, 4294967295, %v3603_v19  ;;  %vm2370_vm0 = vmor %vm459_vm5, %vm555_vm9  ;;  %vm321_vm7 = vcmp.eq.s32.totalorder %v2081_v6, %v2060_v33  ;;  %vm318_vm9 = vcmp.eq.s32.totalorder %v2072_v55, %v2062_v34 }
 0x102   :  { %790 = vperm.xlu1 %1614, %v747_v23   ;;  %v541_v14 = vpop.permute.xlu0 %540  ;;  %3605 = vst [vmem:[#allocation21_spill] sm:$0xff] %v3604_v19  ;;  %v3607_v24 = vsel %vm2370_vm0, 4294967295, %v3606_v24  ;;  %vm320_vm0 = vcmp.eq.s32.totalorder %v2072_v55, %v2060_v33  ;;  %vm2420_vm6 = vmor %vm241_vm10, %vm321_vm7  ;;  %v3616_v23 = vmov 0  ;;  %vm545_vm7 = vcmp.eq.s32.totalorder %v2081_v6, %v2220_v15 }
 0x103   :  { %vm572_vm3 = vcmp.eq.s32.totalorder %v2072_v55, %v541_v14  ;;  %vm573_vm12 = vcmp.eq.s32.totalorder %v2081_v6, %v541_v14  ;;  %v3611_v14 = vmov 0  ;;  %vm448_vm10 = vcmp.eq.s32.totalorder %v2072_v55, %v2177_v20 }
 0x104   :  { %vm2389_vm5 = vmor %vm476_vm13, %vm572_vm3  ;;  %vm238_vm3 = vcmp.eq.s32.totalorder %v2072_v55, %v1986_v18  ;;  %vm239_vm13 = vcmp.eq.s32.totalorder %v2081_v6, %v1986_v18  ;;  %v3620_v33 = vmov 0  ;;  %v3625_v15 = vmov 0 }
 0x105   :  { %v2382_v22 = vpop.permute.xlu1 %658  ;;  %v3609_v10 = vsel %vm2389_vm5, 4294967295, %v3608_v10  ;;  %vm2398_vm4 = vmor %vm477_vm15, %vm573_vm12  ;;  %vm319_vm5 = vcmp.eq.s32.totalorder %v2081_v6, %v2062_v34  ;;  %vm446_vm15 = vcmp.eq.s32.totalorder %v2072_v55, %v2179_v38  ;;  %vm542_vm12 = vcmp.eq.s32.totalorder %v2072_v55, %v2218_v9 }
 0x106   :  { %1615 = vset.pattern.permute.xlu1 %v3570_v5  ;;  %3610 = vst [vmem:[#allocation22_spill] sm:$0xff] %v3609_v10  ;;  %v3612_v14 = vsel %vm2398_vm4, 4294967295, %v3611_v14  ;;  %vm2429_vm8 = vmor %vm238_vm3, %vm318_vm9  ;;  %vm447_vm3 = vcmp.eq.s32.totalorder %v2081_v6, %v2179_v38  ;;  %v492_v10 = vadd.s32 56, %v1855_v0 }
 0x107   :  { %926 = vperm.xlu1 %1615, %v899_v56   ;;  %v656_v41 = vpop.permute.xlu0 %655  ;;  %3613 = vst [vmem:[#allocation23_spill] sm:$0xff] %v3612_v14  ;;  %v1003_v56 = vadd.s32 168, %v1847_v57  ;;  %v3617_v23 = vsel %vm2429_vm8, 4294967295, %v3616_v23  ;;  %vm2433_vm4 = vmor %vm239_vm13, %vm319_vm5  ;;  %vm3622_vm5 = vcmp.eq.s32.totalorder %v2072_v55, %v2002_v32  ;;  %v3627_v32 = vmov 0 }
 0x108   :  { %vm2441_vm1 = vmor %vm446_vm15, %vm542_vm12  ;;  %vm449_vm15 = vcmp.eq.s32.totalorder %v2081_v6, %v2177_v20  ;;  %vm703_vm9 = vcmp.eq.s32.totalorder %v2081_v6, %v656_v41  ;;  %v1629_v14 = vmov 0.0  }
 0x109   :  { %v2410_v25 = vpop.permute.xlu1 %682  ;;  %v3621_v33 = vsel %vm2441_vm1, 4294967295, %v3620_v33  ;;  %vm2453_vm13 = vmor %vm3622_vm5, %vm320_vm0  ;;  %vm798_vm0 = vcmp.eq.s32.totalorder %v2072_v55, %v2274_v12  ;;  %vm3629_vm5 = vcmp.eq.s32.totalorder %v2072_v55, %v2340_v53 }
 0x10a   :  { %vm2459_vm12 = vmor %vm448_vm10, %vm544_vm14  ;;  %vm958_vm14 = vcmp.eq.s32.totalorder %v2072_v55, %v2310_v49  ;;  %vm799_vm10 = vcmp.eq.s32.totalorder %v2081_v6, %v2274_v12 }
 0x10b   :  { %1022 = vperm.xlu1 %1615, %v995_v61   ;;  %v2426_v34 = vpop.permute.xlu0 %775  ;;  %v3623_v61 = vmov 0  ;;  %v3626_v15 = vsel %vm2459_vm12, 4294967295, %v3625_v15  ;;  %vm2468_vm11 = vmor %vm449_vm15, %vm545_vm7  ;;  %vm3632_vm7 = vcmp.eq.s32.totalorder %v2072_v55, %v656_v41 }
 0x10c   :  { %v3624_v61 = vsel %vm2453_vm13, 4294967295, %v3623_v61  ;;  %v3628_v32 = vsel %vm2468_vm11, 4294967295, %v3627_v32  ;;  %vm2481_vm8 = vmor %vm958_vm14, %vm3629_vm5  ;;  %vm1055_vm13 = vcmp.eq.s32.totalorder %v2081_v6, %v2340_v53  ;;  %v644_v53 = vadd.s32 112, %v1738_v30 }
 0x10d   :  { %v2448_v57 = vpop.permute.xlu1 %778  ;;  %vm2487_vm15 = vmor %vm3632_vm7, %vm798_vm0  ;;  %vm3635_vm7 = vnez %v3626_v15  ;;  %vm3636_vm14 = vnez %v3624_v61  ;;  %vm3638_vm11 = vnez %v3617_v23  ;;  %v740_v30 = vadd.s32 112, %v1831_v36 }
 0x10e   :  { %vm831_vm1 = vmor %vm703_vm9, %vm799_vm10  ;;  %vm959_vm9 = vcmp.eq.s32.totalorder %v2081_v6, %v2310_v49 }
 0x10f   :  { %1046 = vperm.xlu1 %1615, %v1003_v56   ;;  %v755_v20 = vpop.permute.xlu0 %754  ;;  %vm575_vm12 = vmor %vm447_vm3, %vm543_vm2  ;;  %vm3523_vm2 = vcmask 785408  }
 0x110   :  { %vm607_vm5 = vmor %vm2433_vm4, %vm575_vm12  ;;  %vm3637_vm12 = vnez %v3621_v33 }
 0x111   :  { %vm863_vm0 = vmor %vm607_vm5, %vm831_vm1 }
 0x112   :  { %v915_v12 = vpop.permute.xlu1 %914  ;;  %vm1087_vm10 = vmor %vm959_vm9, %vm1055_vm13  ;;  %vm800_vm13 = vcmp.eq.s32.totalorder %v2072_v55, %v755_v20  ;;  %vm801_vm9 = vcmp.eq.s32.totalorder %v2081_v6, %v755_v20 }
 0x113   :  { %1616 = vset.pattern.permute.xlu1 %v3567_v47  ;;  %v2501_v41 = vpop.permute.xlu0 %685  ;;  %vm1119_vm3 = vmor %vm863_vm0, %vm1087_vm10  ;;  %vm704_vm0 = vcmp.eq.s32.totalorder %v2072_v55, %v2382_v22 }
 0x114   :  { %537 = vperm.xlu1 %1616, %v492_v10   ;;  %v1473_v19 = vsel %vm1119_vm3, 1.0, %v1629_v14  ;;  %vm606_vm1 = vmor %vm3638_vm11, %vm3637_vm12  ;;  %vm705_vm11 = vcmp.eq.s32.totalorder %v2081_v6, %v2382_v22  ;;  %v748_v22 = vadd.s32 112, %v1855_v0 }
 0x115   :  { %1504 = vmatprep.mubr.msk.f32.mxu0 %vm3523_vm2, %v1473_v19  ;;  %vm862_vm5 = vmor %vm606_vm1, %vm2487_vm15  ;;  %vm3641_vm1 = vnez %v3628_v32  ;;  %v908_v32 = vadd.s32 168, %v1799_v60 }
 0x116   :  { %v1011_v56 = vpop.permute.xlu1 %1010  ;;  %vm1118_vm10 = vmor %vm862_vm5, %vm2481_vm8 }
 0x117   :  { %v2516_v49 = vpop.permute.xlu0 %760  ;;  %v1472_v19 = vsel %vm1118_vm10, 1.0, %v1629_v14  ;;  %vm2531_vm3 = vmor %vm704_vm0, %vm800_vm13  ;;  %vm1056_vm15 = vcmp.eq.s32.totalorder %v2072_v55, %v1011_v56  ;;  %vm1057_vm8 = vcmp.eq.s32.totalorder %v2081_v6, %v1011_v56  ;;  %vm960_vm13 = vcmp.eq.s32.totalorder %v2072_v55, %v915_v12 }
 0x118   :  { %1617 = vset.pattern.permute.xlu1 %v3568_v2  ;;  %1356 = vmatmul.mubr.f32.vlgmr.msra.gmra.mrb[0].mxu0 %v1472_v19  ;;  %vm833_vm12 = vmor %vm705_vm11, %vm801_vm9  ;;  %vm961_vm0 = vcmp.eq.s32.totalorder %v2081_v6, %v915_v12  ;;  %v996_v12 = vadd.s32 168, %v1831_v36  ;;  %v3661_v56 = vmov 0 }
 0x119   :  { %673 = vperm.xlu1 %1617, %v644_v53   ;;  %vm3642_vm5 = vmor %vm2420_vm6, %vm3641_vm1  ;;  %vm257_vm1 = vcmp.eq.s32.totalorder %v2081_v6, %v2035_v1 }
 0x11a   :  { %v2536_v23 = vpop.permute.xlu1 %1034  ;;  %vm865_vm10 = vmor %vm3642_vm5, %vm833_vm12  ;;  %vm3644_vm12 = vcmask 785408   ;;  %vm817_vm5 = vcmp.eq.s32.totalorder %v2081_v6, %v2448_v57 }
 0x11b   :  { %v2539_v33 = vpop.permute.xlu0 %691  ;;  %vm1088_vm2 = vmor %vm960_vm13, %vm1056_vm15  ;;  %vm337_vm15 = vcmp.eq.s32.totalorder %v2081_v6, %v2098_v40  ;;  %vm3649_vm13 = vnez %v3574_v11 }
 0x11c   :  { %vm1089_vm4 = vmor %vm961_vm0, %vm1057_vm8  ;;  %vm558_vm8 = vcmp.eq.s32.totalorder %v2072_v55, %v2223_v45 }
 0x11d   :  { %769 = vperm.xlu1 %1617, %v740_v30   ;;  %vm1121_vm9 = vmor %vm865_vm10, %vm1089_vm4  ;;  %vm336_vm10 = vcmp.eq.s32.totalorder %v2072_v55, %v2098_v40  ;;  %v3650_v40 = vmov 0 }
 0x11e   :  { %v1475_v18 = vsel %vm1121_vm9, 1.0, %v1629_v14  ;;  %vm3643_vm6 = vmor %vm3636_vm14, %vm3635_vm7  ;;  %vm814_vm7 = vcmp.eq.s32.totalorder %v2072_v55, %v2426_v34  ;;  %vm718_vm9 = vcmp.eq.s32.totalorder %v2072_v55, %v2246_v26 }
 0x11f   :  { %v2549_v20 = vpop.permute.xlu1 %525  ;;  %v2551_v38 = vpop.permute.xlu0 %766  ;;  %vm864_vm11 = vmor %vm3643_vm6, %vm2531_vm3  ;;  %1505 = vmatprep.mubr.msk.f32.mxu0 %vm3644_vm12, %v1475_v18  ;;  %vm815_vm6 = vcmp.eq.s32.totalorder %v2081_v6, %v2426_v34  ;;  %v653_v18 = vadd.s32 112, %v1797_v59  ;;  %v3723_v34 = vmov 0 }
 0x120   :  { %vm1120_vm4 = vmor %vm864_vm11, %vm1088_vm2  ;;  %vm462_vm2 = vcmp.eq.s32.totalorder %v2072_v55, %v2200_v13  ;;  %vm559_vm11 = vcmp.eq.s32.totalorder %v2081_v6, %v2223_v45  ;;  %v3652_v45 = vmov 0  ;;  %vm563_vm0 = vcmp.eq.s32.totalorder %v2081_v6, %v2549_v20 }
 0x121   :  { %793 = vperm.xlu1 %1617, %v748_v22   ;;  %v1474_v0 = vsel %vm1120_vm4, 1.0, %v1629_v14  ;;  %vm2572_vm14 = vmor %vm257_vm1, %vm337_vm15  ;;  %vm721_vm15 = vcmp.eq.s32.totalorder %v2081_v6, %v2410_v25  ;;  %vm256_vm4 = vcmp.eq.s32.totalorder %v2072_v55, %v2035_v1  ;;  %v3730_v1 = vmov 0 }
 0x122   :  { %1361 = vmatmul.mubr.f32.gmra.mrb[2].mxu0 %v1474_v0  ;;  %vm2582_vm3 = vmor %vm462_vm2, %vm558_vm8  ;;  %vm719_vm8 = vcmp.eq.s32.totalorder %v2081_v6, %v2246_v26  ;;  %v485_v26 = vadd.s32 56, %v1829_v35  ;;  %v749_v0 = vadd.s32 112, %v1853_v63 }
 0x123   :  { %v2570_v61 = vpop.permute.xlu0 %697  ;;  %vm2604_vm12 = vmor %vm718_vm9, %vm814_vm7  ;;  %vm463_vm7 = vcmp.eq.s32.totalorder %v2081_v6, %v2200_v13  ;;  %v3659_v13 = vmov 0 }
 0x124   :  { %v2580_v9 = vpop.permute.xlu1 %661  ;;  %v3651_v40 = vsel %vm2604_vm12, 4294967295, %v3650_v40  ;;  %vm849_vm1 = vmor %vm721_vm15, %vm817_vm5  ;;  %vm467_vm5 = vcmp.eq.s32.totalorder %v2081_v6, %v2204_v3 }
 0x125   :  { %1618 = vset.pattern.permute.xlu1 %v3570_v5  ;;  %vm2616_vm2 = vmor %vm256_vm4, %vm336_vm10  ;;  %vm816_vm4 = vcmp.eq.s32.totalorder %v2072_v55, %v2448_v57 }
 0x126   :  { %953 = vperm.xlu1 %1618, %v908_v32   ;;  %v3653_v45 = vsel %vm2616_vm2, 4294967295, %v3652_v45  ;;  %vm2622_vm9 = vmor %vm719_vm8, %vm815_vm6 }
 0x127   :  { %v2608_v53 = vpop.permute.xlu0 %772  ;;  %vm2628_vm12 = vmor %vm463_vm7, %vm559_vm11 }
 0x128   :  { %v2614_v36 = vpop.permute.xlu1 %757  ;;  %vm3658_vm10 = vmor %vm2572_vm14, %vm3649_vm13  ;;  %vm707_vm14 = vcmp.eq.s32.totalorder %v2081_v6, %v2580_v9  ;;  %vm3663_vm13 = vnez %v3546_v39  ;;  %v3759_v39 = vmov 0 }
 0x129   :  { %vm2639_vm6 = vmor %vm3658_vm10, %vm849_vm1  ;;  %vm803_vm15 = vcmp.eq.s32.totalorder %v2081_v6, %v2614_v36 }
 0x12a   :  { %1025 = vperm.xlu1 %1618, %v996_v12   ;;  %v3660_v13 = vsel %vm2639_vm6, 4294967295, %v3659_v13  ;;  %vm2646_vm11 = vmor %vm467_vm5, %vm563_vm0  ;;  %vm720_vm0 = vcmp.eq.s32.totalorder %v2072_v55, %v2410_v25  ;;  %v645_v25 = vadd.s32 112, %v1736_v29  ;;  %vm466_vm6 = vcmp.eq.s32.totalorder %v2072_v55, %v2204_v3 }
 0x12b   :  { %v3662_v56 = vsel %vm2646_vm11, 4294967295, %v3661_v56  ;;  %vm623_vm8 = vmor %vm3663_vm13, %vm2628_vm12 }
 0x12c   :  { %v2650_v30 = vpop.permute.xlu1 %781  ;;  %v936_v19 = vpop.permute.xlu0 %935  ;;  %vm835_vm1 = vmor %vm707_vm14, %vm803_vm15  ;;  %vm3668_vm14 = vnez %v3544_v28 }
 0x12d   :  { %vm2672_vm12 = vmor %vm623_vm8, %vm2622_vm9  ;;  %vm1070_vm9 = vcmp.eq.s32.totalorder %v2072_v55, %v2356_v51  ;;  %vm3669_vm8 = vnez %v3578_v43  ;;  %v3679_v43 = vmov 0  ;;  %vm3685_vm5 = vcmp.eq.s32.totalorder %v2072_v55, %v936_v19 }
 0x12e   :  { %1619 = vset.pattern.permute.xlu1 %v3567_v47  ;;  %vm2676_vm15 = vmor %vm720_vm0, %vm816_vm4  ;;  %v3666_v47 = vmov 0  ;;  %vm3670_vm4 = vnez %v3582_v58  ;;  %v3683_v58 = vmov 0 }
 0x12f   :  { %516 = vperm.xlu1 %1619, %v485_v26   ;;  %v3667_v47 = vsel %vm2676_vm15, 4294967295, %v3666_v47  ;;  %vm622_vm13 = vmor %vm3668_vm14, %vm2582_vm3  ;;  %vm3674_vm3 = vnez %v3651_v40  ;;  %vm975_vm15 = vcmp.eq.s32.totalorder %v2081_v6, %v936_v19  ;;  %v3734_v26 = vmov 0  ;;  %v3803_v40 = vld [vmem:[#allocation6_spill] sm:$0xff] }
 0x130   :  { %v939_v11 = vpop.permute.xlu0 %938  ;;  %vm3671_vm0 = vmor %vm3669_vm8, %vm3670_vm4  ;;  %vm3678_vm8 = vcmp.eq.s32.totalorder %v2072_v55, %v2549_v20 }
 0x131   :  { %vm2694_vm7 = vmor %vm3671_vm0, %vm835_vm1  ;;  %vm977_vm10 = vcmp.eq.s32.totalorder %v2081_v6, %v939_v11  ;;  %v2699_v28 = vpop.permute.xlu1 %941  ;;  %vm1073_vm1 = vcmp.eq.s32.totalorder %v2081_v6, %v2536_v23  ;;  %vm3682_vm0 = vcmp.eq.s32.totalorder %v2081_v6, %v2501_v41 }
 0x132   :  { %vm2703_vm14 = vmor %vm622_vm13, %vm3674_vm3  ;;  %vm3681_vm13 = vcmp.eq.s32.totalorder %v2081_v6, %v2650_v30 }
 0x133   :  { %vm2716_vm4 = vmor %vm466_vm6, %vm3678_vm8  ;;  %1621 = vset.pattern.permute.xlu1 %v3568_v2  ;;  %vm1071_vm8 = vcmp.eq.s32.totalorder %v2081_v6, %v2356_v51 }
 0x134   :  { %v3680_v43 = vsel %vm2716_vm4, 4294967295, %v3679_v43  ;;  %vm2726_vm3 = vmor %vm3682_vm0, %vm3681_vm13  ;;  %vm3690_vm13 = vnez %v3551_v8  ;;  %676 = vperm.xlu1 %1621, %v645_v25   ;;  %v2752_v20 = vpop.permute.xlu0 %917  ;;  %v3717_v8 = vmov 0 }
 0x135   :  { %v3684_v58 = vsel %vm2726_vm3, 4294967295, %v3683_v58  ;;  %vm2733_vm2 = vmor %vm3685_vm5, %vm1070_vm9  ;;  %vm3691_vm5 = vnez %v3660_v13  ;;  %v1014_v2 = vpop.permute.xlu1 %1013  ;;  %vm802_vm3 = vcmp.eq.s32.totalorder %v2072_v55, %v2614_v36  ;;  %vm963_vm11 = vcmp.eq.s32.totalorder %v2081_v6, %v2752_v20 }
 0x136   :  { %vm2737_vm6 = vmor %vm977_vm10, %vm1073_vm1  ;;  %vm976_vm10 = vcmp.eq.s32.totalorder %v2072_v55, %v939_v11  ;;  %v997_v13 = vadd.s32 168, %v1829_v35  ;;  %v1005_v35 = vadd.s32 168, %v1853_v63 }
 0x137   :  { %vm1137_vm9 = vmor %vm3691_vm5, %vm2737_vm6  ;;  %vm1059_vm6 = vcmp.eq.s32.totalorder %v2081_v6, %v1014_v2  ;;  %vm1072_vm5 = vcmp.eq.s32.totalorder %v2072_v55, %v2536_v23  ;;  %v3794_v23 = vld [vmem:[#allocation18_spill] sm:$0xff] }
 0x138   :  { %vm1103_vm1 = vmor %vm975_vm15, %vm1071_vm8  ;;  %v1491_v51 = vsel %vm1137_vm9, 1.0, %v1629_v14  ;;  %vm706_vm8 = vcmp.eq.s32.totalorder %v2072_v55, %v2580_v9  ;;  %700 = vperm.xlu1 %1621, %v653_v18   ;;  %v1038_v15 = vpop.permute.xlu0 %1037 }
 0x139   :  { %vm1135_vm0 = vmor %vm2672_vm12, %vm1103_vm1  ;;  %vm722_vm12 = vcmp.eq.s32.totalorder %v2072_v55, %v2501_v41  ;;  %vm818_vm1 = vcmp.eq.s32.totalorder %v2072_v55, %v2650_v30  ;;  %v3708_v41 = vmov 0 }
 0x13a   :  { %v1489_v59 = vsel %vm1135_vm0, 1.0, %v1629_v14  ;;  %vm1134_vm15 = vmor %vm2703_vm14, %vm2733_vm2  ;;  %vm3694_vm2 = vcmask 785408   ;;  %v505_v60 = vpop.permute.xlu1 %504 }
 0x13b   :  { %vm2780_vm0 = vmor %vm976_vm10, %vm1072_vm5  ;;  %1512 = vmatprep.mubr.msk.f32.mxu1 %vm3694_vm2, %v1489_v59  ;;  %v1488_v32 = vsel %vm1134_vm15, 1.0, %v1629_v14  ;;  %vm3711_vm10 = vnez %v3684_v58 }
 0x13c   :  { %vm2789_vm14 = vmor %vm706_vm8, %vm802_vm3  ;;  %1396 = vmatmul.mubr.f32.vlgmr.msra.gmra.mrb[0].mxu1 %v1488_v32  ;;  %vm261_vm3 = vcmp.eq.s32.totalorder %v2081_v6, %v2041_v7  ;;  %796 = vperm.xlu1 %1621, %v749_v0   ;;  %v945_v19 = vpop.permute.xlu0 %944  ;;  %v3870_v32 = vld [vmem:[#allocation15_spill] sm:$0xff] }
 0x13d   :  { %vm1091_vm9 = vmor %vm963_vm11, %vm1059_vm6  ;;  %vm3700_vm11 = vnez %v3667_v47  ;;  %vm3701_vm6 = vnez %v3653_v45 }
 0x13e   :  { %vm1123_vm5 = vmor %vm2694_vm7, %vm1091_vm9 }
 0x13f   :  { %vm3697_vm15 = vmmov %vm3694_vm2  ;;  %vm3702_vm2 = vnez %v3572_v54  ;;  %v1477_v36 = vsel %vm1123_vm5, 1.0, %v1629_v14  ;;  %v901_v54 = vadd.s32 168, %v1736_v29  ;;  %vm3707_vm5 = vcmp.eq.s32.totalorder %v2081_v6, %v2116_v52  ;;  %v3879_v29 = vld [vmem:[#allocation5_spill] sm:$0xff] }
 0x140   :  { %1513 = vmatprep.mubr.msk.f32.mxu1 %vm3697_vm15, %v1491_v51  ;;  %vm2808_vm8 = vmor %vm722_vm12, %vm818_vm1  ;;  %vm1075_vm15 = vcmp.eq.s32.totalorder %v2081_v6, %v1038_v15  ;;  %vm244_vm1 = vcmp.eq.s32.totalorder %v2072_v55, %v2000_v31  ;;  %1623 = vset.pattern.permute.xlu1 %v3570_v5  ;;  %v924_v58 = vpop.permute.xlu0 %923  ;;  %v3820_v5 = vld [vmem:[#allocation19_spill] sm:$0xff] }
 0x141   :  { %vm3703_vm7 = vmor %vm3701_vm6, %vm3702_vm2  ;;  %vm3706_vm6 = vcmask 785408   ;;  %932 = vperm.xlu1 %1623, %v901_v54   ;;  %v3865_v51 = vld [vmem:[#allocation7_spill] sm:$0xff] }
 0x142   :  { %vm2819_vm9 = vmor %vm3703_vm7, %vm3700_vm11  ;;  %1506 = vmatprep.mubr.msk.f32.mxu0 %vm3706_vm6, %v1477_v36  ;;  %vm3710_vm7 = vnez %v3548_v50  ;;  %v3805_v36 = vld [vmem:[#allocation2_spill] sm:$0xff] }
 0x143   :  { %vm1136_vm11 = vmor %vm2819_vm9, %vm2780_vm0  ;;  %vm3712_vm0 = vnez %v3662_v56 }
 0x144   :  { %vm2840_vm2 = vmor %vm261_vm3, %vm3707_vm5  ;;  %vm979_vm3 = vcmp.eq.s32.totalorder %v2081_v6, %v2699_v28  ;;  %v1490_v45 = vsel %vm1136_vm11, 1.0, %v1629_v14  ;;  %vm3716_vm5 = vcmp.eq.s32.totalorder %v2072_v55, %v2065_v42  ;;  %vm3719_vm11 = vcmp.eq.s32.totalorder %v2072_v55, %v2116_v52  ;;  %v1044_v59 = vpop.permute.xlu0 %1043 }
 0x145   :  { %v3709_v41 = vsel %vm2840_vm2, 4294967295, %v3708_v41  ;;  %vm3713_vm9 = vmor %vm3690_vm13, %vm3712_vm0  ;;  %vm260_vm13 = vcmp.eq.s32.totalorder %v2072_v55, %v2041_v7  ;;  %1401 = vmatmul.mubr.f32.gmra.mrb[2].mxu1 %v1490_v45  ;;  %v3720_v7 = vmov 0  ;;  %1028 = vperm.xlu1 %1623, %v997_v13   ;;  %v3808_v45 = vld [vmem:[#allocation14_spill] sm:$0xff]  ;;  %v3817_v13 = vld [vmem:[#allocation4_spill] sm:$0xff] }
 0x146   :  { %vm2855_vm6 = vmor %vm3713_vm9, %vm3711_vm10  ;;  %vm245_vm9 = vcmp.eq.s32.totalorder %v2081_v6, %v2000_v31  ;;  %vm548_vm10 = vcmp.eq.s32.totalorder %v2072_v55, %v505_v60  ;;  %v665_v31 = vpop.permute.xlu1 %664 }
 0x147   :  { %vm1107_vm0 = vmor %vm979_vm3, %vm1075_vm15  ;;  %vm3725_vm15 = vcmp.eq.s32.totalorder %v2072_v55, %v1014_v2 }
 0x148   :  { %vm2877_vm12 = vmor %vm244_vm1, %vm3716_vm5  ;;  %vm3722_vm1 = vcmp.eq.s32.totalorder %v2081_v6, %v2065_v42 }
 0x149   :  { %v3718_v8 = vsel %vm2877_vm12, 4294967295, %v3717_v8  ;;  %vm2884_vm4 = vmor %vm260_vm13, %vm3719_vm11  ;;  %vm453_vm13 = vcmp.eq.s32.totalorder %v2081_v6, %v2185_v21  ;;  %vm978_vm11 = vcmp.eq.s32.totalorder %v2072_v55, %v2699_v28  ;;  %vm3732_vm12 = vcmask 785408   ;;  %1052 = vperm.xlu1 %1623, %v1005_v35   ;;  %v3822_v35 = vld [vmem:[#allocation20_spill] sm:$0xff] }
 0x14a   :  { %v3721_v7 = vsel %vm2884_vm4, 4294967295, %v3720_v7  ;;  %vm1139_vm3 = vmor %vm2855_vm6, %vm1107_vm0  ;;  %vm3726_vm6 = vcmp.eq.s32.totalorder %v2072_v55, %v2752_v20  ;;  %v689_v56 = vpop.permute.xlu1 %688  ;;  %v3774_v20 = vld [vmem:[#allocation9_spill] sm:$0xff] }
 0x14b   :  { %vm2896_vm5 = vmor %vm245_vm9, %vm3722_vm1  ;;  %vm549_vm9 = vcmp.eq.s32.totalorder %v2081_v6, %v505_v60  ;;  %v1493_v42 = vsel %vm1139_vm3, 1.0, %v1629_v14  ;;  %vm3729_vm1 = vcmp.eq.s32.totalorder %v2072_v55, %v1038_v15 }
 0x14c   :  { %v3724_v34 = vsel %vm2896_vm5, 4294967295, %v3723_v34  ;;  %vm2909_vm0 = vmor %vm3726_vm6, %vm3725_vm15  ;;  %1514 = vmatprep.mubr.msk.f32.mxu1 %vm3732_vm12, %v1493_v42  ;;  %vm3733_vm15 = vcmp.eq.s32.totalorder %v2072_v55, %v2185_v21  ;;  %vm3739_vm12 = vnez %v3580_v17  ;;  %v3816_v42 = vld [vmem:[#allocation8_spill] sm:$0xff] }
 0x14d   :  { %vm2918_vm5 = vmor %vm978_vm11, %vm3729_vm1  ;;  %vm3738_vm11 = vnez %v3576_v48 }
 0x14e   :  { %v3731_v1 = vsel %vm2918_vm5, 4294967295, %v3730_v1  ;;  %vm2927_vm6 = vmor %vm3733_vm15, %vm548_vm10  ;;  %v785_v63 = vpop.permute.xlu1 %784  ;;  %vm804_vm10 = vcmp.eq.s32.totalorder %v2072_v55, %v2516_v49 }
 0x14f   :  { %v3735_v26 = vsel %vm2927_vm6, 4294967295, %v3734_v26  ;;  %vm2931_vm3 = vmor %vm453_vm13, %vm549_vm9  ;;  %vm3742_vm9 = vnez %v3680_v43  ;;  %vm820_vm2 = vcmp.eq.s32.totalorder %v2072_v55, %v785_v63  ;;  %vm724_vm6 = vcmp.eq.s32.totalorder %v2072_v55, %v689_v56 }
 0x150   :  { %vm3740_vm1 = vmor %vm3738_vm11, %vm3739_vm12  ;;  %vm709_vm12 = vcmp.eq.s32.totalorder %v2081_v6, %v665_v31  ;;  %v3770_v43 = vmov 0 }
 0x151   :  { %vm866_vm4 = vmor %vm3740_vm1, %vm2789_vm14  ;;  %vm725_vm1 = vcmp.eq.s32.totalorder %v2081_v6, %v689_v56 }
 0x152   :  { %vm1122_vm5 = vmor %vm866_vm4, %vm2909_vm0  ;;  %vm805_vm4 = vcmp.eq.s32.totalorder %v2081_v6, %v2516_v49  ;;  %vm3744_vm0 = vnez %v3731_v1  ;;  %v921_v48 = vpop.permute.xlu1 %920  ;;  %v3754_v49 = vmov 0 }
 0x153   :  { %v1476_v21 = vsel %vm1122_vm5, 1.0, %v1629_v14  ;;  %vm3743_vm14 = vmor %vm3710_vm7, %vm3742_vm9  ;;  %vm708_vm9 = vcmp.eq.s32.totalorder %v2072_v55, %v665_v31 }
 0x154   :  { %vm882_vm15 = vmor %vm3743_vm14, %vm2808_vm8  ;;  %1366 = vmatmul.mubr.f32.gmra.mrb[4].mxu0 %v1476_v21  ;;  %vm3748_vm14 = vnez %v3724_v34 }
 0x155   :  { %vm1138_vm11 = vmor %vm882_vm15, %vm3744_vm0  ;;  %vm821_vm0 = vcmp.eq.s32.totalorder %v2081_v6, %v785_v63 }
 0x156   :  { %v1492_v50 = vsel %vm1138_vm11, 1.0, %v1629_v14  ;;  %vm613_vm15 = vmor %vm3748_vm14, %vm2931_vm3  ;;  %vm3751_vm3 = vnez %v3709_v41  ;;  %vm3752_vm14 = vnez %v3586_v44  ;;  %v1017_v30 = vpop.permute.xlu1 %1016 }
 0x157   :  { %1406 = vmatmul.mubr.f32.gmra.mrb[4].mxu1 %v1492_v50  ;;  %vm837_vm13 = vmor %vm709_vm12, %vm805_vm4  ;;  %v951_v50 = vpop.permute.xlu0 %950 }
 0x158   :  { %vm836_vm5 = vmor %vm708_vm9, %vm804_vm10  ;;  %vm3756_vm10 = vnez %v3718_v8 }
 0x159   :  { %vm853_vm7 = vmor %vm725_vm1, %vm821_vm0  ;;  %vm3762_vm0 = vnez %v3584_v27 }
 0x15a   :  { %vm2981_vm11 = vmor %vm613_vm15, %vm837_vm13  ;;  %vm3757_vm13 = vnez %v3735_v26  ;;  %vm3761_vm15 = vnez %v3721_v7  ;;  %v1041_v47 = vpop.permute.xlu1 %1040  ;;  %v3884_v7 = vld [vmem:[#allocation23_spill] sm:$0xff] }
 0x15b   :  { %vm852_vm8 = vmor %vm724_vm6, %vm820_vm2  ;;  %vm964_vm2 = vcmp.eq.s32.totalorder %v2072_v55, %v921_v48  ;;  %vm1060_vm6 = vcmp.eq.s32.totalorder %v2072_v55, %v1017_v30 }
 0x15c   :  { %vm3753_vm4 = vmor %vm3751_vm3, %vm3752_vm14 }
 0x15d   :  { %vm2991_vm12 = vmor %vm3753_vm4, %vm853_vm7  ;;  %vm1061_vm7 = vcmp.eq.s32.totalorder %v2081_v6, %v1017_v30 }
 0x15e   :  { %v3755_v49 = vsel %vm2991_vm12, 4294967295, %v3754_v49  ;;  %vm3758_vm1 = vmor %vm3756_vm10, %vm3757_vm13  ;;  %vm980_vm13 = vcmp.eq.s32.totalorder %v2072_v55, %v945_v19  ;;  %vm981_vm12 = vcmp.eq.s32.totalorder %v2081_v6, %v945_v19  ;;  %v532_v25 = vpop.permute.xlu1 %531 }
 0x15f   :  { %vm3000_vm9 = vmor %vm3758_vm1, %vm836_vm5  ;;  %vm965_vm5 = vcmp.eq.s32.totalorder %v2081_v6, %v921_v48  ;;  %v3826_v48 = vmov 0 }
 0x160   :  { %v3760_v39 = vsel %vm3000_vm9, 4294967295, %v3759_v39  ;;  %vm3763_vm3 = vmor %vm3761_vm15, %vm3762_vm0  ;;  %vm1076_vm9 = vcmp.eq.s32.totalorder %v2072_v55, %v1041_v47  ;;  %vm1077_vm15 = vcmp.eq.s32.totalorder %v2081_v6, %v1041_v47 }
 0x161   :  { %vm3012_vm14 = vmor %vm3763_vm3, %vm852_vm8  ;;  %vm3766_vm8 = vnez %v3760_v39 }
 0x162   :  { %vm1092_vm4 = vmor %vm964_vm2, %vm1060_vm6  ;;  %vm3767_vm2 = vcmask 785408   ;;  %v668_v3 = vpop.permute.xlu1 %667 }
 0x163   :  { %vm1093_vm10 = vmor %vm965_vm5, %vm1061_vm7 }
 0x164   :  { %vm1125_vm1 = vmor %vm2981_vm11, %vm1093_vm10  ;;  %vm3768_vm11 = vnez %v3755_v49 }
 0x165   :  { %v1479_v27 = vsel %vm1125_vm1, 1.0, %v1629_v14  ;;  %vm1124_vm0 = vmor %vm3766_vm8, %vm1092_vm4  ;;  %vm470_vm4 = vcmp.eq.s32.totalorder %v2072_v55, %v2207_v62 }
 0x166   :  { %vm1108_vm3 = vmor %vm980_vm13, %vm1076_vm9  ;;  %1507 = vmatprep.mubr.msk.f32.mxu0 %vm3767_vm2, %v1479_v27  ;;  %v1478_v11 = vsel %vm1124_vm0, 1.0, %v1629_v14  ;;  %vm566_vm9 = vcmp.eq.s32.totalorder %v2072_v55, %v532_v25  ;;  %vm471_vm13 = vcmp.eq.s32.totalorder %v2081_v6, %v2207_v62  ;;  %v764_v22 = vpop.permute.xlu1 %763  ;;  %v3776_v62 = vld [vmem:[#allocation11_spill] sm:$0xff]  ;;  %v3832_v27 = vld [vmem:[#allocation16_spill] sm:$0xff] }
 0x167   :  { %vm1109_vm6 = vmor %vm981_vm12, %vm1077_vm15  ;;  %1371 = vmatmul.mubr.f32.gmra.mrb[6].mxu0 %v1478_v11  ;;  %vm567_vm12 = vcmp.eq.s32.totalorder %v2081_v6, %v532_v25  ;;  %vm806_vm15 = vcmp.eq.s32.totalorder %v2072_v55, %v764_v22  ;;  %v3833_v11 = vmov 0 }
 0x168   :  { %vm1141_vm7 = vmor %vm3768_vm11, %vm1109_vm6  ;;  %vm3777_vm6 = vnez %v3776_v62 }
 0x169   :  { %v1495_v57 = vsel %vm1141_vm7, 1.0, %v1629_v14  ;;  %vm1140_vm5 = vmor %vm3012_vm14, %vm1108_vm3  ;;  %vm807_vm3 = vcmp.eq.s32.totalorder %v2081_v6, %v764_v22  ;;  %vm710_vm7 = vcmp.eq.s32.totalorder %v2072_v55, %v668_v3  ;;  %v3846_v22 = vmov 0 }
 0x16a   :  { %vm3769_vm10 = vmmov %vm3767_vm2  ;;  %v1494_v28 = vsel %vm1140_vm5, 1.0, %v1629_v14  ;;  %vm726_vm2 = vcmp.eq.s32.totalorder %v2072_v55, %v2539_v33  ;;  %vm727_vm5 = vcmp.eq.s32.totalorder %v2081_v6, %v2539_v33  ;;  %v788_v2 = vpop.permute.xlu1 %787  ;;  %v3783_v33 = vmov 0 }
 0x16b   :  { %1515 = vmatprep.mubr.msk.f32.mxu1 %vm3769_vm10, %v1495_v57  ;;  %vm3041_vm1 = vmor %vm470_vm4, %vm566_vm9  ;;  %vm711_vm10 = vcmp.eq.s32.totalorder %v2081_v6, %v668_v3  ;;  %vm822_vm4 = vcmp.eq.s32.totalorder %v2072_v55, %v788_v2  ;;  %v3839_v3 = vld [vmem:[#allocation13_spill] sm:$0xff] }
 0x16c   :  { %1411 = vmatmul.mubr.f32.gmra.mrb[6].mxu1 %v1494_v28  ;;  %v3771_v43 = vsel %vm3041_vm1, 4294967295, %v3770_v43  ;;  %vm3045_vm14 = vmor %vm471_vm13, %vm567_vm12  ;;  %vm823_vm13 = vcmp.eq.s32.totalorder %v2081_v6, %v788_v2  ;;  %vm3781_vm1 = vnez %v3596_v37  ;;  %v3790_v37 = vmov 0  ;;  %v3837_v28 = vld [vmem:[#allocation12_spill] sm:$0xff] }
 0x16d   :  { %vm631_vm11 = vmor %vm3777_vm6, %vm3045_vm14  ;;  %vm3780_vm6 = vnez %v3591_v4  ;;  %v3792_v4 = vld [vmem:[#allocation17_spill] sm:$0xff] }
 0x16e   :  { %vm3065_vm9 = vmor %vm710_vm7, %vm806_vm15  ;;  %v948_v0 = vpop.permute.xlu1 %947 }
 0x16f   :  { %vm839_vm12 = vmor %vm711_vm10, %vm807_vm3  ;;  %vm1078_vm3 = vcmp.eq.s32.totalorder %v2072_v55, %v1044_v59  ;;  %vm1079_vm10 = vcmp.eq.s32.totalorder %v2081_v6, %v1044_v59 }
 0x170   :  { %vm854_vm0 = vmor %vm726_vm2, %vm822_vm4  ;;  %vm3787_vm2 = vnez %v3774_v20 }
 0x171   :  { %vm855_vm14 = vmor %vm727_vm5, %vm823_vm13  ;;  %vm3788_vm5 = vnez %v3771_v43  ;;  %v930_v43 = vpop.permute.xlu0 %929 }
 0x172   :  { %vm3782_vm8 = vmor %vm3780_vm6, %vm3781_vm1  ;;  %vm982_vm1 = vcmp.eq.s32.totalorder %v2072_v55, %v948_v0  ;;  %v1020_v15 = vpop.permute.xlu1 %1019 }
 0x173   :  { %vm3076_vm7 = vmor %vm3782_vm8, %vm839_vm12  ;;  %vm983_vm8 = vcmp.eq.s32.totalorder %v2081_v6, %v948_v0  ;;  %vm3795_vm12 = vnez %v3794_v23  ;;  %v3867_v0 = vld [vmem:[#allocation3_spill] sm:$0xff] }
 0x174   :  { %v3784_v33 = vsel %vm3076_vm7, 4294967295, %v3783_v33  ;;  %vm3080_vm15 = vmor %vm631_vm11, %vm855_vm14  ;;  %vm3793_vm11 = vnez %v3792_v4 }
 0x175   :  { %vm3789_vm4 = vmor %vm3787_vm2, %vm3788_vm5  ;;  %v1050_v62 = vpop.permute.xlu0 %1049 }
 0x176   :  { %vm3091_vm13 = vmor %vm3789_vm4, %vm854_vm0  ;;  %vm966_vm0 = vcmp.eq.s32.totalorder %v2072_v55, %v924_v58  ;;  %vm967_vm4 = vcmp.eq.s32.totalorder %v2081_v6, %v924_v58  ;;  %v511_v54 = vpop.permute.xlu1 %510  ;;  %v3841_v58 = vmov 0 }
 0x177   :  { %v3791_v37 = vsel %vm3091_vm13, 4294967295, %v3790_v37  ;;  %vm3796_vm14 = vmor %vm3793_vm11, %vm3795_vm12  ;;  %vm1062_vm13 = vcmp.eq.s32.totalorder %v2072_v55, %v1020_v15  ;;  %vm1063_vm11 = vcmp.eq.s32.totalorder %v2081_v6, %v1020_v15 }
 0x178   :  { %vm3104_vm6 = vmor %vm3796_vm14, %vm3065_vm9  ;;  %vm3799_vm9 = vnez %v3791_v37 }
 0x179   :  { %vm1110_vm2 = vmor %vm982_vm1, %vm1078_vm3  ;;  %vm3802_vm3 = vcmask 785408   ;;  %vm3804_vm1 = vnez %v3784_v33 }
 0x17a   :  { %vm1111_vm5 = vmor %vm983_vm8, %vm1079_vm10  ;;  %v671_v31 = vpop.permute.xlu1 %670 }
 0x17b   :  { %vm1143_vm7 = vmor %vm3080_vm15, %vm1111_vm5  ;;  %vm328_vm15 = vcmp.eq.s32.totalorder %v2072_v55, %v3803_v40  ;;  %vm456_vm5 = vcmp.eq.s32.totalorder %v2072_v55, %v3808_v45 }
 0x17c   :  { %v1497_v9 = vsel %vm1143_vm7, 1.0, %v1629_v14  ;;  %vm1142_vm12 = vmor %vm3799_vm9, %vm1110_vm2  ;;  %vm248_vm7 = vcmp.eq.s32.totalorder %v2072_v55, %v3805_v36 }
 0x17d   :  { %vm3117_vm14 = vmor %vm966_vm0, %vm1062_vm13  ;;  %1516 = vmatprep.mubr.msk.f32.mxu1 %vm3802_vm3, %v1497_v9  ;;  %v1496_v12 = vsel %vm1142_vm12, 1.0, %v1629_v14  ;;  %vm329_vm13 = vcmp.eq.s32.totalorder %v2081_v6, %v3803_v40  ;;  %vm457_vm12 = vcmp.eq.s32.totalorder %v2081_v6, %v3808_v45  ;;  %v3882_v45 = vld [vmem:[#allocation22_spill] sm:$0xff] }
 0x17e   :  { %vm1095_vm10 = vmor %vm967_vm4, %vm1063_vm11  ;;  %1416 = vmatmul.mubr.f32.gmra.mrb[8].mxu1 %v1496_v12  ;;  %vm552_vm4 = vcmp.eq.s32.totalorder %v2072_v55, %v511_v54  ;;  %vm553_vm11 = vcmp.eq.s32.totalorder %v2081_v6, %v511_v54  ;;  %v695_v52 = vpop.permute.xlu1 %694  ;;  %v3878_v54 = vld [vmem:[#allocation10_spill] sm:$0xff] }
 0x17f   :  { %vm1127_vm8 = vmor %vm3804_vm1, %vm1095_vm10  ;;  %vm808_vm10 = vcmp.eq.s32.totalorder %v2072_v55, %v2551_v38  ;;  %vm809_vm1 = vcmp.eq.s32.totalorder %v2081_v6, %v2551_v38  ;;  %v3814_v38 = vmov 0 }
 0x180   :  { %v1481_v41 = vsel %vm1127_vm8, 1.0, %v1629_v14  ;;  %vm1126_vm2 = vmor %vm3104_vm6, %vm3117_vm14  ;;  %vm249_vm6 = vcmp.eq.s32.totalorder %v2081_v6, %v3805_v36  ;;  %v3876_v36 = vmov 0 }
 0x181   :  { %vm3136_vm0 = vmor %vm248_vm7, %vm328_vm15  ;;  %v1480_v8 = vsel %vm1126_vm2, 1.0, %v1629_v14  ;;  %vm712_vm2 = vcmp.eq.s32.totalorder %v2072_v55, %v671_v31 }
 0x182   :  { %vm3809_vm9 = vmmov %vm3802_vm3  ;;  %v791_v1 = vpop.permute.xlu1 %790 }
 0x183   :  { %1508 = vmatprep.mubr.msk.f32.mxu0 %vm3809_vm9, %v1481_v41  ;;  %vm3148_vm3 = vmor %vm456_vm5, %vm552_vm4  ;;  %vm713_vm5 = vcmp.eq.s32.totalorder %v2081_v6, %v671_v31 }
 0x184   :  { %1376 = vmatmul.mubr.f32.gmra.mrb[8].mxu0 %v1480_v8  ;;  %vm585_vm14 = vmor %vm457_vm12, %vm553_vm11  ;;  %vm345_vm12 = vcmp.eq.s32.totalorder %v2081_v6, %v3816_v42 }
 0x185   :  { %vm361_vm15 = vmor %vm249_vm6, %vm329_vm13  ;;  %vm265_vm6 = vcmp.eq.s32.totalorder %v2081_v6, %v3817_v13 }
 0x186   :  { %vm616_vm8 = vmor %vm3136_vm0, %vm3148_vm3  ;;  %vm344_vm0 = vcmp.eq.s32.totalorder %v2072_v55, %v3816_v42  ;;  %vm264_vm3 = vcmp.eq.s32.totalorder %v2072_v55, %v3817_v13  ;;  %v927_v56 = vpop.permute.xlu1 %926 }
 0x187   :  { %vm617_vm7 = vmor %vm361_vm15, %vm585_vm14  ;;  %vm825_vm15 = vcmp.eq.s32.totalorder %v2081_v6, %v791_v1 }
 0x188   :  { %vm840_vm4 = vmor %vm712_vm2, %vm808_vm10  ;;  %vm729_vm2 = vcmp.eq.s32.totalorder %v2081_v6, %v695_v52 }
 0x189   :  { %vm841_vm11 = vmor %vm713_vm5, %vm809_vm1  ;;  %vm824_vm1 = vcmp.eq.s32.totalorder %v2072_v55, %v791_v1  ;;  %vm728_vm5 = vcmp.eq.s32.totalorder %v2072_v55, %v695_v52  ;;  %v3888_v52 = vmov 0 }
 0x18a   :  { %vm3167_vm13 = vmor %vm617_vm7, %vm841_vm11  ;;  %v1023_v63 = vpop.permute.xlu1 %1022 }
 0x18b   :  { %vm3171_vm9 = vmor %vm616_vm8, %vm840_vm4  ;;  %vm3821_vm8 = vnez %v3820_v5 }
 0x18c   :  { %v3815_v38 = vsel %vm3171_vm9, 4294967295, %v3814_v38  ;;  %vm3183_vm14 = vmor %vm264_vm3, %vm344_vm0  ;;  %vm3823_vm0 = vnez %v3822_v35 }
 0x18d   :  { %vm377_vm10 = vmor %vm265_vm6, %vm345_vm12  ;;  %vm968_vm12 = vcmp.eq.s32.totalorder %v2072_v55, %v927_v56  ;;  %vm1064_vm6 = vcmp.eq.s32.totalorder %v2072_v55, %v1023_v63 }
 0x18e   :  { %vm632_vm7 = vmor %vm3183_vm14, %vm3821_vm8  ;;  %vm1065_vm14 = vcmp.eq.s32.totalorder %v2081_v6, %v1023_v63  ;;  %v1047_v17 = vpop.permute.xlu1 %1046 }
 0x18f   :  { %vm857_vm4 = vmor %vm729_vm2, %vm825_vm15  ;;  %vm969_vm15 = vcmp.eq.s32.totalorder %v2081_v6, %v927_v56  ;;  %vm984_vm2 = vcmp.eq.s32.totalorder %v2072_v55, %v951_v50 }
 0x190   :  { %vm856_vm11 = vmor %vm728_vm5, %vm824_vm1 }
 0x191   :  { %vm633_vm3 = vmor %vm377_vm10, %vm3823_vm0  ;;  %vm1080_vm0 = vcmp.eq.s32.totalorder %v2072_v55, %v1047_v17 }
 0x192   :  { %vm3197_vm9 = vmor %vm633_vm3, %vm857_vm4  ;;  %vm985_vm4 = vcmp.eq.s32.totalorder %v2081_v6, %v951_v50  ;;  %vm1081_vm3 = vcmp.eq.s32.totalorder %v2081_v6, %v1047_v17 }
 0x193   :  { %vm3204_vm8 = vmor %vm632_vm7, %vm856_vm11  ;;  %vm3828_vm7 = vnez %v3815_v38  ;;  %v538_v19 = vpop.permute.xlu1 %537  ;;  %v957_v38 = vpop.permute.xlu0 %956 }
 0x194   :  { %v3827_v48 = vsel %vm3204_vm8, 4294967295, %v3826_v48  ;;  %vm1096_vm1 = vmor %vm968_vm12, %vm1064_vm6  ;;  %vm3829_vm12 = vcmask 785408  }
 0x195   :  { %vm1097_vm10 = vmor %vm969_vm15, %vm1065_vm14  ;;  %vm3830_vm14 = vnez %v3827_v48 }
 0x196   :  { %vm1129_vm5 = vmor %vm3167_vm13, %vm1097_vm10 }
 0x197   :  { %v1483_v49 = vsel %vm1129_vm5, 1.0, %v1629_v14  ;;  %vm1128_vm11 = vmor %vm3828_vm7, %vm1096_vm1  ;;  %vm570_vm1 = vcmp.eq.s32.totalorder %v2072_v55, %v538_v19  ;;  %vm474_vm5 = vcmp.eq.s32.totalorder %v2072_v55, %v3832_v27  ;;  %vm3843_vm7 = vnez %v3542_v16 }
 0x198   :  { %vm1112_vm8 = vmor %vm984_vm2, %vm1080_vm0  ;;  %1509 = vmatprep.mubr.msk.f32.mxu0 %vm3829_vm12, %v1483_v49  ;;  %v1482_v30 = vsel %vm1128_vm11, 1.0, %v1629_v14  ;;  %v674_v47 = vpop.permute.xlu1 %673  ;;  %vm571_vm2 = vcmp.eq.s32.totalorder %v2081_v6, %v538_v19  ;;  %v3852_v16 = vmov 0 }
 0x199   :  { %vm1113_vm6 = vmor %vm985_vm4, %vm1081_vm3  ;;  %1381 = vmatmul.mubr.f32.gmra.mrb[10].mxu0 %v1482_v30  ;;  %vm3838_vm3 = vnez %v3837_v28 }
 0x19a   :  { %vm1145_vm13 = vmor %vm3197_vm9, %vm1113_vm6  ;;  %vm475_vm9 = vcmp.eq.s32.totalorder %v2081_v6, %v3832_v27 }
 0x19b   :  { %v1499_v39 = vsel %vm1145_vm13, 1.0, %v1629_v14  ;;  %vm1144_vm15 = vmor %vm3830_vm14, %vm1112_vm8  ;;  %vm714_vm13 = vcmp.eq.s32.totalorder %v2072_v55, %v674_v47  ;;  %vm715_vm14 = vcmp.eq.s32.totalorder %v2081_v6, %v674_v47 }
 0x19c   :  { %vm3831_vm10 = vmmov %vm3829_vm12  ;;  %v1498_v44 = vsel %vm1144_vm15, 1.0, %v1629_v14  ;;  %v770_v57 = vpop.permute.xlu1 %769  ;;  %vm3840_vm12 = vnez %v3839_v3 }
 0x19d   :  { %1517 = vmatprep.mubr.msk.f32.mxu1 %vm3831_vm10, %v1499_v39  ;;  %vm3233_vm4 = vmor %vm474_vm5, %vm570_vm1  ;;  %vm810_vm0 = vcmp.eq.s32.totalorder %v2072_v55, %v770_v57  ;;  %vm811_vm11 = vcmp.eq.s32.totalorder %v2081_v6, %v770_v57  ;;  %vm730_vm10 = vcmp.eq.s32.totalorder %v2072_v55, %v2570_v61 }
 0x19e   :  { %1421 = vmatmul.mubr.f32.gmra.mrb[10].mxu1 %v1498_v44  ;;  %v3834_v11 = vsel %vm3233_vm4, 4294967295, %v3833_v11  ;;  %vm3237_vm8 = vmor %vm475_vm9, %vm571_vm2  ;;  %vm731_vm9 = vcmp.eq.s32.totalorder %v2081_v6, %v2570_v61 }
 0x19f   :  { %vm635_vm6 = vmor %vm3840_vm12, %vm3237_vm8 }
 0x1a0   :  { %vm3253_vm15 = vmor %vm714_vm13, %vm810_vm0  ;;  %v794_v10 = vpop.permute.xlu1 %793  ;;  %vm3844_vm0 = vnez %v3607_v24  ;;  %v3856_v24 = vld [vmem:[#allocation21_spill] sm:$0xff] }
 0x1a1   :  { %v3842_v58 = vsel %vm3253_vm15, 4294967295, %v3841_v58  ;;  %vm843_vm1 = vmor %vm715_vm14, %vm811_vm11  ;;  %vm826_vm2 = vcmp.eq.s32.totalorder %v2072_v55, %v794_v10  ;;  %vm827_vm5 = vcmp.eq.s32.totalorder %v2081_v6, %v794_v10  ;;  %vm3850_vm11 = vnez %v3834_v11 }
 0x1a2   :  { %vm858_vm8 = vmor %vm730_vm10, %vm826_vm2  ;;  %vm3854_vm2 = vnez %v3842_v58 }
 0x1a3   :  { %vm859_vm12 = vmor %vm731_vm9, %vm827_vm5  ;;  %vm3855_vm5 = vnez %v3540_v46  ;;  %vm3857_vm9 = vnez %v3856_v24 }
 0x1a4   :  { %vm3845_vm13 = vmor %vm3843_vm7, %vm3844_vm0  ;;  %vm1082_vm7 = vcmp.eq.s32.totalorder %v2072_v55, %v1050_v62 }
 0x1a5   :  { %vm3268_vm15 = vmor %vm3845_vm13, %vm843_vm1  ;;  %v954_v18 = vpop.permute.xlu1 %953 }
 0x1a6   :  { %v3847_v22 = vsel %vm3268_vm15, 4294967295, %v3846_v22  ;;  %vm3272_vm4 = vmor %vm635_vm6, %vm859_vm12  ;;  %vm986_vm1 = vcmp.eq.s32.totalorder %v2072_v55, %v954_v18  ;;  %vm987_vm6 = vcmp.eq.s32.totalorder %v2081_v6, %v954_v18 }
 0x1a7   :  { %vm3851_vm14 = vmor %vm3838_vm3, %vm3850_vm11  ;;  %vm1083_vm3 = vcmp.eq.s32.totalorder %v2081_v6, %v1050_v62 }
 0x1a8   :  { %vm3281_vm10 = vmor %vm3851_vm14, %vm858_vm8  ;;  %vm970_vm14 = vcmp.eq.s32.totalorder %v2072_v55, %v930_v43 }
 0x1a9   :  { %v3853_v16 = vsel %vm3281_vm10, 4294967295, %v3852_v16  ;;  %vm3858_vm12 = vmor %vm3855_vm5, %vm3857_vm9  ;;  %v1026_v2 = vpop.permute.xlu1 %1025  ;;  %vm971_vm9 = vcmp.eq.s32.totalorder %v2081_v6, %v930_v43 }
 0x1aa   :  { %vm3295_vm0 = vmor %vm3858_vm12, %vm3854_vm2  ;;  %vm1066_vm15 = vcmp.eq.s32.totalorder %v2072_v55, %v1026_v2  ;;  %vm1067_vm10 = vcmp.eq.s32.totalorder %v2081_v6, %v1026_v2  ;;  %vm3861_vm2 = vnez %v3853_v16 }
 0x1ab   :  { %vm1114_vm8 = vmor %vm986_vm1, %vm1082_vm7  ;;  %vm3864_vm7 = vcmask 785408  }
 0x1ac   :  { %vm1115_vm13 = vmor %vm987_vm6, %vm1083_vm3  ;;  %vm3866_vm6 = vnez %v3847_v22 }
 0x1ad   :  { %vm1147_vm11 = vmor %vm3272_vm4, %vm1115_vm13  ;;  %vm332_vm4 = vcmp.eq.s32.totalorder %v2072_v55, %v3865_v51 }
 0x1ae   :  { %v1501_v46 = vsel %vm1147_vm11, 1.0, %v1629_v14  ;;  %vm1146_vm5 = vmor %vm3861_vm2, %vm1114_vm8  ;;  %vm252_vm8 = vcmp.eq.s32.totalorder %v2072_v55, %v3867_v0  ;;  %v517_v37 = vpop.permute.xlu1 %516 }
 0x1af   :  { %vm3309_vm12 = vmor %vm970_vm14, %vm1066_vm15  ;;  %1518 = vmatprep.mubr.msk.f32.mxu1 %vm3864_vm7, %v1501_v46  ;;  %v1500_v33 = vsel %vm1146_vm5, 1.0, %v1629_v14  ;;  %vm333_vm15 = vcmp.eq.s32.totalorder %v2081_v6, %v3865_v51  ;;  %vm556_vm14 = vcmp.eq.s32.totalorder %v2072_v55, %v517_v37  ;;  %vm557_vm2 = vcmp.eq.s32.totalorder %v2081_v6, %v517_v37 }
 0x1b0   :  { %vm1099_vm1 = vmor %vm971_vm9, %vm1067_vm10  ;;  %1426 = vmatmul.mubr.f32.gmra.mrb[12].mxu1 %v1500_v33  ;;  %vm460_vm10 = vcmp.eq.s32.totalorder %v2072_v55, %v3870_v32  ;;  %vm461_vm9 = vcmp.eq.s32.totalorder %v2081_v6, %v3870_v32 }
 0x1b1   :  { %vm1131_vm3 = vmor %vm3866_vm6, %vm1099_vm1  ;;  %vm812_vm6 = vcmp.eq.s32.totalorder %v2072_v55, %v2608_v53 }
 0x1b2   :  { %v1485_v4 = vsel %vm1131_vm3, 1.0, %v1629_v14  ;;  %vm1130_vm13 = vmor %vm3295_vm0, %vm3309_vm12  ;;  %vm253_vm0 = vcmp.eq.s32.totalorder %v2081_v6, %v3867_v0 }
 0x1b3   :  { %vm3328_vm11 = vmor %vm252_vm8, %vm332_vm4  ;;  %v1484_v15 = vsel %vm1130_vm13, 1.0, %v1629_v14  ;;  %v677_v60 = vpop.permute.xlu1 %676 }
 0x1b4   :  { %vm3871_vm5 = vmmov %vm3864_vm7  ;;  %vm716_vm8 = vcmp.eq.s32.totalorder %v2072_v55, %v677_v60  ;;  %vm717_vm13 = vcmp.eq.s32.totalorder %v2081_v6, %v677_v60 }
 0x1b5   :  { %1510 = vmatprep.mubr.msk.f32.mxu0 %vm3871_vm5, %v1485_v4  ;;  %vm3340_vm7 = vmor %vm460_vm10, %vm556_vm14  ;;  %vm813_vm10 = vcmp.eq.s32.totalorder %v2081_v6, %v2608_v53  ;;  %vm348_vm5 = vcmp.eq.s32.totalorder %v2072_v55, %v3878_v54 }
 0x1b6   :  { %1386 = vmatmul.mubr.f32.gmra.mrb[12].mxu0 %v1484_v15  ;;  %vm589_vm12 = vmor %vm461_vm9, %vm557_vm2  ;;  %vm349_vm9 = vcmp.eq.s32.totalorder %v2081_v6, %v3878_v54 }
 0x1b7   :  { %vm365_vm4 = vmor %vm253_vm0, %vm333_vm15  ;;  %v701_v40 = vpop.permute.xlu1 %700  ;;  %vm269_vm0 = vcmp.eq.s32.totalorder %v2081_v6, %v3879_v29 }
 0x1b8   :  { %vm620_vm1 = vmor %vm3328_vm11, %vm3340_vm7  ;;  %vm268_vm7 = vcmp.eq.s32.totalorder %v2072_v55, %v3879_v29 }
 0x1b9   :  { %vm621_vm3 = vmor %vm365_vm4, %vm589_vm12 }
 0x1ba   :  { %vm844_vm14 = vmor %vm716_vm8, %vm812_vm6 }
 0x1bb   :  { %vm845_vm2 = vmor %vm717_vm13, %vm813_vm10  ;;  %v797_v41 = vpop.permute.xlu1 %796  ;;  %vm732_vm13 = vcmp.eq.s32.totalorder %v2072_v55, %v701_v40  ;;  %vm733_vm10 = vcmp.eq.s32.totalorder %v2081_v6, %v701_v40 }
 0x1bc   :  { %vm3359_vm15 = vmor %vm621_vm3, %vm845_vm2  ;;  %vm828_vm4 = vcmp.eq.s32.totalorder %v2072_v55, %v797_v41  ;;  %vm829_vm6 = vcmp.eq.s32.totalorder %v2081_v6, %v797_v41  ;;  %vm3883_vm3 = vnez %v3882_v45 }
 0x1bd   :  { %vm3363_vm11 = vmor %vm620_vm1, %vm844_vm14 }
 0x1be   :  { %v3877_v36 = vsel %vm3363_vm11, 4294967295, %v3876_v36  ;;  %vm380_vm12 = vmor %vm268_vm7, %vm348_vm5  ;;  %vm3885_vm5 = vnez %v3884_v7 }
 0x1bf   :  { %vm3376_vm1 = vmor %vm269_vm0, %vm349_vm9 }
 0x1c0   :  { %vm636_vm8 = vmor %vm380_vm12, %vm3883_vm3  ;;  %v933_v8 = vpop.permute.xlu1 %932 }
 0x1c1   :  { %vm860_vm14 = vmor %vm732_vm13, %vm828_vm4  ;;  %vm972_vm0 = vcmp.eq.s32.totalorder %v2072_v55, %v933_v8  ;;  %vm973_vm4 = vcmp.eq.s32.totalorder %v2081_v6, %v933_v8  ;;  %vm988_vm13 = vcmp.eq.s32.totalorder %v2072_v55, %v957_v38 }
 0x1c2   :  { %vm861_vm2 = vmor %vm733_vm10, %vm829_vm6 }
 0x1c3   :  { %vm637_vm9 = vmor %vm3376_vm1, %vm3885_vm5 }
 0x1c4   :  { %v1029_v31 = vpop.permute.xlu1 %1028  ;;  %vm3389_vm7 = vmor %vm636_vm8, %vm860_vm14 }
 0x1c5   :  { %vm1068_vm12 = vcmp.eq.s32.totalorder %v2072_v55, %v1029_v31  ;;  %vm1069_vm3 = vcmp.eq.s32.totalorder %v2081_v6, %v1029_v31  ;;  %vm3396_vm11 = vmor %vm637_vm9, %vm861_vm2  ;;  %vm3890_vm2 = vnez %v3877_v36  ;;  %vm989_vm9 = vcmp.eq.s32.totalorder %v2081_v6, %v957_v38 }
 0x1c6   :  { %v3889_v52 = vsel %vm3396_vm11, 4294967295, %v3888_v52  ;;  %vm1100_vm6 = vmor %vm972_vm0, %vm1068_vm12  ;;  %vm3891_vm0 = vcmask 785408  }
 0x1c7   :  { %vm1101_vm1 = vmor %vm973_vm4, %vm1069_vm3  ;;  %vm3892_vm3 = vnez %v3889_v52 }
 0x1c8   :  { %vm1133_vm8 = vmor %vm3359_vm15, %vm1101_vm1  ;;  %v1053_v42 = vpop.permute.xlu1 %1052 }
 0x1c9   :  { %vm1084_vm10 = vcmp.eq.s32.totalorder %v2072_v55, %v1053_v42  ;;  %vm1085_vm14 = vcmp.eq.s32.totalorder %v2081_v6, %v1053_v42  ;;  %v1487_v1 = vsel %vm1133_vm8, 1.0, %v1629_v14  ;;  %vm1132_vm5 = vmor %vm3890_vm2, %vm1100_vm6 }
 0x1ca   :  { %vm1116_vm11 = vmor %vm988_vm13, %vm1084_vm10  ;;  %1511 = vmatprep.mubr.msk.f32.mxu0 %vm3891_vm0, %v1487_v1  ;;  %v1486_v13 = vsel %vm1132_vm5, 1.0, %v1629_v14 }
 0x1cb   :  { %vm1117_vm15 = vmor %vm989_vm9, %vm1085_vm14  ;;  %1391 = vmatmul.mubr.f32.gmra.mrb[14].mxu0 %v1486_v13 }
 0x1cc   :  { %vm1148_vm12 = vmor %vm3389_vm7, %vm1116_vm11 }
 0x1cd   :  { %vm1149_vm4 = vmor %vm3892_vm3, %vm1117_vm15  ;;  %v1502_v55 = vsel %vm1148_vm12, 1.0, %v1629_v14 }
 0x1ce   :  { %v1503_v26 = vsel %vm1149_vm4, 1.0, %v1629_v14  ;;  %vm3893_vm6 = vmmov %vm3891_vm0 }
 0x1cf   :  { %1519 = vmatprep.mubr.msk.f32.mxu1 %vm3893_vm6, %v1503_v26 }
 0x1d0   :  { %1431 = vmatmul.mubr.f32.gmra.mrb[14].mxu1 %v1502_v55 }
 0x1eb   :  { %v1357_v6 = vpop.f32.mrb[0].mxu0 }
 0x1ec   :  { %1436 = vst [vmem:[%s3469_s2] sm:$0xff] %v1357_v6  ;;  %v1359_v5 = vpop.f32.mrb[1].mxu0 }
 0x1f5   :  { %v1362_v56 = vpop.f32.mrb[2].mxu0 }
 0x1f6   :  { %1437 = vst [vmem:[%s3469_s2 + $0x8] sm:$0xff] %v1362_v56  ;;  %v1364_v35 = vpop.f32.mrb[3].mxu0 }
 0x20f   :  { %v1397_v21 = vpop.f32.mrb[0].mxu1 }
 0x210   :  { %1444 = vst [vmem:[%s3469_s2 + $0x40] sm:$0xff] %v1397_v21  ;;  %v1399_v14 = vpop.f32.mrb[1].mxu1 }
 0x218   :  { %v1402_v63 = vpop.f32.mrb[2].mxu1 }
 0x219   :  { %1445 = vst [vmem:[%s3469_s2 + $0x48] sm:$0xff] %v1402_v63  ;;  %v1404_v50 = vpop.f32.mrb[3].mxu1 }
 0x227   :  { %v1367_v48 = vpop.f32.mrb[4].mxu0 }
 0x228   :  { %1438 = vst [vmem:[%s3469_s2 + $0x10] sm:$0xff] %v1367_v48  ;;  %v1369_v17 = vpop.f32.mrb[5].mxu0 }
 0x22a   :  { %v1407_v49 = vpop.f32.mrb[4].mxu1 }
 0x22b   :  { %1446 = vst [vmem:[%s3469_s2 + $0x50] sm:$0xff] %v1407_v49  ;;  %v1409_v30 = vpop.f32.mrb[5].mxu1 }
 0x23a   :  { %v1372_v19 = vpop.f32.mrb[6].mxu0 }
 0x23b   :  { %1439 = vst [vmem:[%s3469_s2 + $0x18] sm:$0xff] %v1372_v19  ;;  %v1374_v39 = vpop.f32.mrb[7].mxu0 }
 0x23f   :  { %v1412_v44 = vpop.f32.mrb[6].mxu1 }
 0x240   :  { %1447 = vst [vmem:[%s3469_s2 + $0x58] sm:$0xff] %v1412_v44  ;;  %v1414_v47 = vpop.f32.mrb[7].mxu1 }
 0x251   :  { %v1417_v27 = vpop.f32.mrb[8].mxu1 }
 0x252   :  { %1448 = vst [vmem:[%s3469_s2 + $0x60] sm:$0xff] %v1417_v27  ;;  %v1419_v11 = vpop.f32.mrb[9].mxu1 }
 0x257   :  { %v1377_v25 = vpop.f32.mrb[8].mxu0 }
 0x258   :  { %1440 = vst [vmem:[%s3469_s2 + $0x20] sm:$0xff] %v1377_v25  ;;  %v1379_v57 = vpop.f32.mrb[9].mxu0 }
 0x26c   :  { %v1382_v28 = vpop.f32.mrb[10].mxu0 }
 0x26d   :  { %1441 = vst [vmem:[%s3469_s2 + $0x28] sm:$0xff] %v1382_v28  ;;  %v1384_v3 = vpop.f32.mrb[11].mxu0 }
 0x271   :  { %v1422_v43 = vpop.f32.mrb[10].mxu1 }
 0x272   :  { %1449 = vst [vmem:[%s3469_s2 + $0x68] sm:$0xff] %v1422_v43  ;;  %v1424_v58 = vpop.f32.mrb[11].mxu1 }
 0x283   :  { %v1427_v10 = vpop.f32.mrb[12].mxu1 }
 0x284   :  { %1450 = vst [vmem:[%s3469_s2 + $0x70] sm:$0xff] %v1427_v10  ;;  %v1429_v22 = vpop.f32.mrb[13].mxu1 }
 0x289   :  { %v1387_v20 = vpop.f32.mrb[12].mxu0 }
 0x28a   :  { %1442 = vst [vmem:[%s3469_s2 + $0x30] sm:$0xff] %v1387_v20  ;;  %v1389_v62 = vpop.f32.mrb[13].mxu0 }
 0x29e   :  { %v1392_v18 = vpop.f32.mrb[14].mxu0 }
 0x29f   :  { %1443 = vst [vmem:[%s3469_s2 + $0x38] sm:$0xff] %v1392_v18  ;;  %v1394_v16 = vpop.f32.mrb[15].mxu0 }
 0x2a3   :  { %v1432_v24 = vpop.f32.mrb[14].mxu1 }
 0x2a4   :  { %1451 = vst [vmem:[%s3469_s2 + $0x78] sm:$0xff] %v1432_v24  ;;  %v1434_v61 = vpop.f32.mrb[15].mxu1 }

</bundles_post_ra>
